<compile_context>
chip_gen: v6e
topology: v6e:2x2x1
jax: 0.10.0
libtpu: 0.0.40
codegen_flags: <defaults>
</compile_context>

<pallas_src>
import jax
import jax.numpy as jnp
from jax.experimental import pallas as pl
from jax.experimental.pallas import tpu as pltpu

# --- hyperparameters mirroring RealformerModel.__init__ -----------------
INPUT_SIZE = 20            # d_model; divisible by num_heads = 5
NUM_CLASSES = 3
NUM_HEADS = 5              # only affects the (dead) per-head split; kept for doc
EXPANSION = 2
NUM_LAYERS = 5
EPS = 1e-5                 # nn.LayerNorm default eps

D = INPUT_SIZE
H = EXPANSION * INPUT_SIZE  # 40
INV_D = 1.0 / D

# Packed weight-slab row offsets (sublane-aligned: multiples of 8)
R_AV = 0                   # folded attention matrix  Wav: rows [0, 20)
R_W1 = 24                  # FFN first matrix         W1 : rows [24, 44)
R_W2 = 48                  # FFN second matrix        W2 : rows [48, 88)
WM_ROWS = 88               # multiple of 8
OUT_PAD = 8                # padded classifier output width (>= NUM_CLASSES)
TB_MAX = 1024              # batch row-tile (well under VMEM even on v7x)


def _layer_norm(x, gamma, beta):
    # Single-pass LN: one sum + one sum-of-squares cross-lane reduce.
    s = jnp.sum(x, axis=-1, keepdims=True)
    s2 = jnp.sum(x * x, axis=-1, keepdims=True)
    mu = s * INV_D
    var = jnp.maximum(s2 * INV_D - mu * mu, 0.0)
    return (x - mu) * jax.lax.rsqrt(var + EPS) * gamma + beta


def realformer_kernel(x_ref, wm_ref, vec_ref, fc_ref, out_ref):
    x = x_ref[...]                                   # (TB, D) f32

    # 5-layer Python unroll (layers are sequentially dependent).
    for l in range(NUM_LAYERS):
        w_av = wm_ref[l, R_AV:R_AV + D, 0:D]         # (D, D)  = Wv @ Wo
        w1 = wm_ref[l, R_W1:R_W1 + D, 0:H]           # (D, H)
        w2 = wm_ref[l, R_W2:R_W2 + H, 0:D]           # (H, D)

        vec = vec_ref[l]                             # (8, H) vector slab
        b_av = vec[0:1, 0:D]                         # (1, D) = bv @ Wo + bo
        g1 = vec[1:2, 0:D]
        be1 = vec[2:3, 0:D]
        b1 = vec[3:4, 0:H]
        b2 = vec[4:5, 0:D]
        g2 = vec[5:6, 0:D]
        be2 = vec[6:7, 0:D]

        # --- attention sublayer (seq==1: softmax == 1, Q/K dead, Wv@Wo folded)
        attn = jnp.dot(x, w_av, preferred_element_type=jnp.float32) + b_av
        x = _layer_norm(x + attn, g1, be1)

        # --- position-wise FFN (ReLU, expansion 2) ---
        h1 = jnp.dot(x, w1, preferred_element_type=jnp.float32) + b1
        h1 = jnp.maximum(h1, 0.0)
        ff = jnp.dot(h1, w2, preferred_element_type=jnp.float32) + b2
        x = _layer_norm(x + ff, g2, be2)

    # --- final classifier: padded (D, OUT_PAD) weight, bias in last row ------
    out_ref[...] = (jnp.dot(x, fc_ref[0:D, :], preferred_element_type=jnp.float32)
                    + fc_ref[D:D + 1, :])


# ------------------------------------------------------------------------
# Parameters (same random layout/convention as the original implementation:
# linear weights stored pre-transposed to (in, out), biases as (1, out)).
# ------------------------------------------------------------------------
def init_params(key):
    L, C = NUM_LAYERS, NUM_CLASSES
    ks = jax.random.split(key, 12)

    def w(k, shape, scl=0.05):
        return (scl * jax.random.normal(k, shape)).astype(jnp.float32)

    return dict(
        wq=w(ks[0], (L, D, D)), bq=w(ks[1], (L, 1, D)),
        wk=w(ks[2], (L, D, D)), bk=w(ks[3], (L, 1, D)),
        wv=w(ks[4], (L, D, D)), bv=w(ks[5], (L, 1, D)),
        wo=w(ks[6], (L, D, D)), bo=w(ks[7], (L, 1, D)),
        g1=jnp.ones((L, 1, D), jnp.float32), be1=jnp.zeros((L, 1, D), jnp.float32),
        w1=w(ks[8], (L, D, H)), b1=jnp.zeros((L, 1, H), jnp.float32),
        w2=w(ks[9], (L, H, D)), b2=jnp.zeros((L, 1, D), jnp.float32),
        g2=jnp.ones((L, 1, D), jnp.float32), be2=jnp.zeros((L, 1, D), jnp.float32),
        wfc=w(ks[10], (D, C)), bfc=w(ks[11], (1, C)),
    )


def pack_params(params):
    """Fold attention (Wv@Wo) and pack the 18 tensors into 3 slabs."""
    L, C = NUM_LAYERS, NUM_CLASSES
    # seq==1: attention output = (x@Wv + bv)@Wo + bo  ->  x@(Wv@Wo) + (bv@Wo + bo)
    w_av = jnp.einsum('lij,ljk->lik', params['wv'], params['wo'])
    b_av = jnp.einsum('lij,ljk->lik', params['bv'], params['wo']) + params['bo']

    wmats = jnp.zeros((L, WM_ROWS, H), jnp.float32)
    wmats = wmats.at[:, R_AV:R_AV + D, 0:D].set(w_av)
    wmats = wmats.at[:, R_W1:R_W1 + D, 0:H].set(params['w1'])
    wmats = wmats.at[:, R_W2:R_W2 + H, 0:D].set(params['w2'])

    vecs = jnp.zeros((L, 8, H), jnp.float32)
    vecs = vecs.at[:, 0:1, 0:D].set(b_av)
    vecs = vecs.at[:, 1:2, 0:D].set(params['g1'])
    vecs = vecs.at[:, 2:3, 0:D].set(params['be1'])
    vecs = vecs.at[:, 3:4, 0:H].set(params['b1'])
    vecs = vecs.at[:, 4:5, 0:D].set(params['b2'])
    vecs = vecs.at[:, 5:6, 0:D].set(params['g2'])
    vecs = vecs.at[:, 6:7, 0:D].set(params['be2'])

    fc = jnp.zeros((D + 1, OUT_PAD), jnp.float32)
    fc = fc.at[0:D, 0:C].set(params['wfc'])
    fc = fc.at[D, 0:C].set(params['bfc'][0])
    return wmats, vecs, fc


def _round_up(n, m):
    return (n + m - 1) // m * m


@jax.jit
def realformer_forward(x, wmats, vecs, fc):
    batch = x.shape[0]
    tb = min(TB_MAX, _round_up(batch, 8))        # batch row tile (multiple of 8)
    b_pad = _round_up(batch, tb)
    if b_pad != batch:
        x = jnp.pad(x, ((0, b_pad - batch), (0, 0)))
    grid = (b_pad // tb,)

    flops = b_pad * (NUM_LAYERS * (2 * D * D + 4 * D * H) + 2 * D * OUT_PAD)
    bytes_accessed = 4 * (b_pad * D + b_pad * OUT_PAD
                          + wmats.size + vecs.size + fc.size)

    out = pl.pallas_call(
        realformer_kernel,
        out_shape=jax.ShapeDtypeStruct((b_pad, OUT_PAD), jnp.float32),
        grid=grid,
        in_specs=[
            pl.BlockSpec((tb, D), lambda i: (i, 0)),                 # x rows
            pl.BlockSpec(wmats.shape, lambda i: (0, 0, 0)),          # resident
            pl.BlockSpec(vecs.shape, lambda i: (0, 0, 0)),           # resident
            pl.BlockSpec(fc.shape, lambda i: (0, 0)),                # resident
        ],
        out_specs=pl.BlockSpec((tb, OUT_PAD), lambda i: (i, 0)),
        compiler_params=pltpu.CompilerParams(
            dimension_semantics=("parallel",),       # both TCs on v7x
        ),
        cost_estimate=pl.CostEstimate(
            flops=flops,
            transcendentals=b_pad * 2 * NUM_LAYERS,
            bytes_accessed=bytes_accessed,
        ),
    )(x, wmats, vecs, fc)
    return out[:batch, :NUM_CLASSES]


# ------------------------------------------------------------------------
# Pure-JAX reference of the original (un-folded) module forward, for checking.
# ------------------------------------------------------------------------
def _ln_ref(x, g, b):
    mu = jnp.mean(x, axis=-1, keepdims=True)
    var = jnp.mean((x - mu) ** 2, axis=-1, keepdims=True)
    return (x - mu) * jax.lax.rsqrt(var + EPS) * g + b


def reference_forward(x, params):
    dk = D // NUM_HEADS
    h = x
    for l in range(NUM_LAYERS):
        q = h @ params['wq'][l] + params['bq'][l]
        k = h @ params['wk'][l] + params['bk'][l]
        v = h @ params['wv'][l] + params['bv'][l]
        heads = []
        for hh in range(NUM_HEADS):
            sl = slice(hh * dk, (hh + 1) * dk)
            s = jnp.sum(q[:, sl] * k[:, sl], -1, keepdims=True) / jnp.sqrt(float(dk))
            p = jax.nn.softmax(s, axis=-1)           # single key -> exactly 1
            heads.append(p * v[:, sl])
        attn = jnp.concatenate(heads, -1) @ params['wo'][l] + params['bo'][l]
        h = _ln_ref(h + attn, params['g1'][l], params['be1'][l])
        ff = (jnp.maximum(h @ params['w1'][l] + params['b1'][l], 0.0)
              @ params['w2'][l] + params['b2'][l])
        h = _ln_ref(h + ff, params['g2'][l], params['be2'][l])
    return h @ params['wfc'] + params['bfc']


if __name__ == "__main__":
    key = jax.random.PRNGKey(0)
    kx, kp = jax.random.split(key)
    batch = 8
    x = jax.random.normal(kx, (batch, INPUT_SIZE), dtype=jnp.float32)
    params = init_params(kp)
    wmats, vecs, fc = pack_params(params)

    out = realformer_forward(x, wmats, vecs, fc)
    out = jax.block_until_ready(out)

    assert out.shape == (batch, NUM_CLASSES)
    assert bool(jnp.all(jnp.isfinite(out)))

    ref = reference_forward(x, params)
    max_err = float(jnp.max(jnp.abs(out - ref)))
    assert max_err < 1e-4, f"mismatch vs reference: {max_err}"

    print("KERNEL_OK")
</pallas_src>

<mosaic_0001>
module attributes {stable_mosaic.version = 11 : i64} {
  func.func @realformer_kernel(%arg0: i32, %arg1: memref<8x20xf32, #tpu.memory_space<vmem>>, %arg2: memref<5x88x40xf32, #tpu.memory_space<vmem>>, %arg3: memref<5x8x40xf32, #tpu.memory_space<vmem>>, %arg4: memref<21x8xf32, #tpu.memory_space<vmem>>, %arg5: memref<8x8xf32, #tpu.memory_space<vmem>>) attributes {dimension_semantics = [#tpu.dimension_semantics<parallel>], iteration_bounds = array<i64: 1>, scalar_prefetch = 0 : i64, scratch_operands = 0 : i64, tpu.core_type = #tpu.core_type<tc>, window_params = [{transform_indices = @transform_0, window_bounds = array<i64: 8, 20>}, {pipeline_mode = #tpu.pipeline_mode<synchronous>, transform_indices = @transform_1, window_bounds = array<i64: 5, 88, 40>}, {pipeline_mode = #tpu.pipeline_mode<synchronous>, transform_indices = @transform_2, window_bounds = array<i64: 5, 8, 40>}, {pipeline_mode = #tpu.pipeline_mode<synchronous>, transform_indices = @transform_3, window_bounds = array<i64: 21, 8>}, {transform_indices = @transform_4, window_bounds = array<i64: 8, 8>}]} {
    %c0 = arith.constant 0 : index
    %c0_0 = arith.constant 0 : index
    %0 = vector.load %arg1[%c0, %c0_0] : memref<8x20xf32, #tpu.memory_space<vmem>>, vector<8x20xf32>
    %c0_1 = arith.constant 0 : index
    %c0_2 = arith.constant 0 : index
    %c0_3 = arith.constant 0 : index
    %1 = vector.load %arg2[%c0_1, %c0_2, %c0_3] : memref<5x88x40xf32, #tpu.memory_space<vmem>>, vector<1x20x20xf32>
    %2 = vector.shape_cast %1 : vector<1x20x20xf32> to vector<20x20xf32>
    %c0_4 = arith.constant 0 : index
    %c24 = arith.constant 24 : index
    %c0_5 = arith.constant 0 : index
    %3 = vector.load %arg2[%c0_4, %c24, %c0_5] : memref<5x88x40xf32, #tpu.memory_space<vmem>>, vector<1x20x40xf32>
    %4 = vector.shape_cast %3 : vector<1x20x40xf32> to vector<20x40xf32>
    %c0_6 = arith.constant 0 : index
    %c48 = arith.constant 48 : index
    %c0_7 = arith.constant 0 : index
    %5 = vector.load %arg2[%c0_6, %c48, %c0_7] : memref<5x88x40xf32, #tpu.memory_space<vmem>>, vector<1x40x20xf32>
    %6 = vector.shape_cast %5 : vector<1x40x20xf32> to vector<40x20xf32>
    %c0_8 = arith.constant 0 : index
    %c0_9 = arith.constant 0 : index
    %c0_10 = arith.constant 0 : index
    %7 = vector.load %arg3[%c0_8, %c0_9, %c0_10] : memref<5x8x40xf32, #tpu.memory_space<vmem>>, vector<1x8x40xf32>
    %8 = vector.shape_cast %7 : vector<1x8x40xf32> to vector<8x40xf32>
    %9 = vector.extract_strided_slice %8 {offsets = [0, 0], sizes = [1, 20], strides = [1, 1]} : vector<8x40xf32> to vector<1x20xf32>
    %10 = vector.extract_strided_slice %8 {offsets = [1, 0], sizes = [1, 20], strides = [1, 1]} : vector<8x40xf32> to vector<1x20xf32>
    %11 = vector.extract_strided_slice %8 {offsets = [2, 0], sizes = [1, 20], strides = [1, 1]} : vector<8x40xf32> to vector<1x20xf32>
    %12 = vector.extract_strided_slice %8 {offsets = [3, 0], sizes = [1, 40], strides = [1, 1]} : vector<8x40xf32> to vector<1x40xf32>
    %13 = vector.extract_strided_slice %8 {offsets = [4, 0], sizes = [1, 20], strides = [1, 1]} : vector<8x40xf32> to vector<1x20xf32>
    %14 = vector.extract_strided_slice %8 {offsets = [5, 0], sizes = [1, 20], strides = [1, 1]} : vector<8x40xf32> to vector<1x20xf32>
    %15 = vector.extract_strided_slice %8 {offsets = [6, 0], sizes = [1, 20], strides = [1, 1]} : vector<8x40xf32> to vector<1x20xf32>
    %cst = arith.constant dense<0.000000e+00> : vector<8x20xf32>
    %16 = tpu.matmul %0, %2, %cst {dimension_numbers = #tpu.dot_dimension_numbers<[1], [0], [0], [1], [0, 0, 1, 1], [], []>} : vector<8x20xf32>, vector<20x20xf32>, vector<8x20xf32> -> vector<8x20xf32>
    %17 = vector.broadcast %9 : vector<1x20xf32> to vector<8x20xf32>
    %18 = arith.addf %16, %17 : vector<8x20xf32>
    %19 = arith.addf %0, %18 : vector<8x20xf32>
    %cst_11 = arith.constant dense<0.000000e+00> : vector<8xf32>
    %20 = vector.multi_reduction <add>, %19, %cst_11 [1] : vector<8x20xf32> to vector<8xf32>
    %21 = vector.shape_cast %20 : vector<8xf32> to vector<8x1xf32>
    %22 = arith.mulf %19, %19 : vector<8x20xf32>
    %cst_12 = arith.constant dense<0.000000e+00> : vector<8xf32>
    %23 = vector.multi_reduction <add>, %22, %cst_12 [1] : vector<8x20xf32> to vector<8xf32>
    %24 = vector.shape_cast %23 : vector<8xf32> to vector<8x1xf32>
    %cst_13 = arith.constant 5.000000e-02 : f32
    %25 = vector.broadcast %cst_13 : f32 to vector<8x1xf32>
    %26 = arith.mulf %21, %25 : vector<8x1xf32>
    %cst_14 = arith.constant 5.000000e-02 : f32
    %27 = vector.broadcast %cst_14 : f32 to vector<8x1xf32>
    %28 = arith.mulf %24, %27 : vector<8x1xf32>
    %29 = arith.mulf %26, %26 : vector<8x1xf32>
    %30 = arith.subf %28, %29 : vector<8x1xf32>
    %cst_15 = arith.constant 0.000000e+00 : f32
    %31 = vector.broadcast %cst_15 : f32 to vector<8x1xf32>
    %32 = arith.maximumf %30, %31 : vector<8x1xf32>
    %33 = vector.broadcast %26 : vector<8x1xf32> to vector<8x20xf32>
    %34 = arith.subf %19, %33 : vector<8x20xf32>
    %cst_16 = arith.constant 9.99999974E-6 : f32
    %35 = vector.broadcast %cst_16 : f32 to vector<8x1xf32>
    %36 = arith.addf %32, %35 : vector<8x1xf32>
    %37 = math.rsqrt %36 : vector<8x1xf32>
    %38 = vector.broadcast %37 : vector<8x1xf32> to vector<8x20xf32>
    %39 = arith.mulf %34, %38 : vector<8x20xf32>
    %40 = vector.broadcast %10 : vector<1x20xf32> to vector<8x20xf32>
    %41 = arith.mulf %39, %40 : vector<8x20xf32>
    %42 = vector.broadcast %11 : vector<1x20xf32> to vector<8x20xf32>
    %43 = arith.addf %41, %42 : vector<8x20xf32>
    %cst_17 = arith.constant dense<0.000000e+00> : vector<8x40xf32>
    %44 = tpu.matmul %43, %4, %cst_17 {dimension_numbers = #tpu.dot_dimension_numbers<[1], [0], [0], [1], [0, 0, 1, 1], [], []>} : vector<8x20xf32>, vector<20x40xf32>, vector<8x40xf32> -> vector<8x40xf32>
    %45 = vector.broadcast %12 : vector<1x40xf32> to vector<8x40xf32>
    %46 = arith.addf %44, %45 : vector<8x40xf32>
    %cst_18 = arith.constant 0.000000e+00 : f32
    %47 = vector.broadcast %cst_18 : f32 to vector<8x40xf32>
    %48 = arith.maximumf %46, %47 : vector<8x40xf32>
    %cst_19 = arith.constant dense<0.000000e+00> : vector<8x20xf32>
    %49 = tpu.matmul %48, %6, %cst_19 {dimension_numbers = #tpu.dot_dimension_numbers<[1], [0], [0], [1], [0, 0, 1, 1], [], []>} : vector<8x40xf32>, vector<40x20xf32>, vector<8x20xf32> -> vector<8x20xf32>
    %50 = vector.broadcast %13 : vector<1x20xf32> to vector<8x20xf32>
    %51 = arith.addf %49, %50 : vector<8x20xf32>
    %52 = arith.addf %43, %51 : vector<8x20xf32>
    %cst_20 = arith.constant dense<0.000000e+00> : vector<8xf32>
    %53 = vector.multi_reduction <add>, %52, %cst_20 [1] : vector<8x20xf32> to vector<8xf32>
    %54 = vector.shape_cast %53 : vector<8xf32> to vector<8x1xf32>
    %55 = arith.mulf %52, %52 : vector<8x20xf32>
    %cst_21 = arith.constant dense<0.000000e+00> : vector<8xf32>
    %56 = vector.multi_reduction <add>, %55, %cst_21 [1] : vector<8x20xf32> to vector<8xf32>
    %57 = vector.shape_cast %56 : vector<8xf32> to vector<8x1xf32>
    %cst_22 = arith.constant 5.000000e-02 : f32
    %58 = vector.broadcast %cst_22 : f32 to vector<8x1xf32>
    %59 = arith.mulf %54, %58 : vector<8x1xf32>
    %cst_23 = arith.constant 5.000000e-02 : f32
    %60 = vector.broadcast %cst_23 : f32 to vector<8x1xf32>
    %61 = arith.mulf %57, %60 : vector<8x1xf32>
    %62 = arith.mulf %59, %59 : vector<8x1xf32>
    %63 = arith.subf %61, %62 : vector<8x1xf32>
    %cst_24 = arith.constant 0.000000e+00 : f32
    %64 = vector.broadcast %cst_24 : f32 to vector<8x1xf32>
    %65 = arith.maximumf %63, %64 : vector<8x1xf32>
    %66 = vector.broadcast %59 : vector<8x1xf32> to vector<8x20xf32>
    %67 = arith.subf %52, %66 : vector<8x20xf32>
    %cst_25 = arith.constant 9.99999974E-6 : f32
    %68 = vector.broadcast %cst_25 : f32 to vector<8x1xf32>
    %69 = arith.addf %65, %68 : vector<8x1xf32>
    %70 = math.rsqrt %69 : vector<8x1xf32>
    %71 = vector.broadcast %70 : vector<8x1xf32> to vector<8x20xf32>
    %72 = arith.mulf %67, %71 : vector<8x20xf32>
    %73 = vector.broadcast %14 : vector<1x20xf32> to vector<8x20xf32>
    %74 = arith.mulf %72, %73 : vector<8x20xf32>
    %75 = vector.broadcast %15 : vector<1x20xf32> to vector<8x20xf32>
    %76 = arith.addf %74, %75 : vector<8x20xf32>
    %c1 = arith.constant 1 : index
    %c0_26 = arith.constant 0 : index
    %c0_27 = arith.constant 0 : index
    %77 = vector.load %arg2[%c1, %c0_26, %c0_27] : memref<5x88x40xf32, #tpu.memory_space<vmem>>, vector<1x20x20xf32>
    %78 = vector.shape_cast %77 : vector<1x20x20xf32> to vector<20x20xf32>
    %c1_28 = arith.constant 1 : index
    %c24_29 = arith.constant 24 : index
    %c0_30 = arith.constant 0 : index
    %79 = vector.load %arg2[%c1_28, %c24_29, %c0_30] : memref<5x88x40xf32, #tpu.memory_space<vmem>>, vector<1x20x40xf32>
    %80 = vector.shape_cast %79 : vector<1x20x40xf32> to vector<20x40xf32>
    %c1_31 = arith.constant 1 : index
    %c48_32 = arith.constant 48 : index
    %c0_33 = arith.constant 0 : index
    %81 = vector.load %arg2[%c1_31, %c48_32, %c0_33] : memref<5x88x40xf32, #tpu.memory_space<vmem>>, vector<1x40x20xf32>
    %82 = vector.shape_cast %81 : vector<1x40x20xf32> to vector<40x20xf32>
    %c1_34 = arith.constant 1 : index
    %c0_35 = arith.constant 0 : index
    %c0_36 = arith.constant 0 : index
    %83 = vector.load %arg3[%c1_34, %c0_35, %c0_36] : memref<5x8x40xf32, #tpu.memory_space<vmem>>, vector<1x8x40xf32>
    %84 = vector.shape_cast %83 : vector<1x8x40xf32> to vector<8x40xf32>
    %85 = vector.extract_strided_slice %84 {offsets = [0, 0], sizes = [1, 20], strides = [1, 1]} : vector<8x40xf32> to vector<1x20xf32>
    %86 = vector.extract_strided_slice %84 {offsets = [1, 0], sizes = [1, 20], strides = [1, 1]} : vector<8x40xf32> to vector<1x20xf32>
    %87 = vector.extract_strided_slice %84 {offsets = [2, 0], sizes = [1, 20], strides = [1, 1]} : vector<8x40xf32> to vector<1x20xf32>
    %88 = vector.extract_strided_slice %84 {offsets = [3, 0], sizes = [1, 40], strides = [1, 1]} : vector<8x40xf32> to vector<1x40xf32>
    %89 = vector.extract_strided_slice %84 {offsets = [4, 0], sizes = [1, 20], strides = [1, 1]} : vector<8x40xf32> to vector<1x20xf32>
    %90 = vector.extract_strided_slice %84 {offsets = [5, 0], sizes = [1, 20], strides = [1, 1]} : vector<8x40xf32> to vector<1x20xf32>
    %91 = vector.extract_strided_slice %84 {offsets = [6, 0], sizes = [1, 20], strides = [1, 1]} : vector<8x40xf32> to vector<1x20xf32>
    %cst_37 = arith.constant dense<0.000000e+00> : vector<8x20xf32>
    %92 = tpu.matmul %76, %78, %cst_37 {dimension_numbers = #tpu.dot_dimension_numbers<[1], [0], [0], [1], [0, 0, 1, 1], [], []>} : vector<8x20xf32>, vector<20x20xf32>, vector<8x20xf32> -> vector<8x20xf32>
    %93 = vector.broadcast %85 : vector<1x20xf32> to vector<8x20xf32>
    %94 = arith.addf %92, %93 : vector<8x20xf32>
    %95 = arith.addf %76, %94 : vector<8x20xf32>
    %cst_38 = arith.constant dense<0.000000e+00> : vector<8xf32>
    %96 = vector.multi_reduction <add>, %95, %cst_38 [1] : vector<8x20xf32> to vector<8xf32>
    %97 = vector.shape_cast %96 : vector<8xf32> to vector<8x1xf32>
    %98 = arith.mulf %95, %95 : vector<8x20xf32>
    %cst_39 = arith.constant dense<0.000000e+00> : vector<8xf32>
    %99 = vector.multi_reduction <add>, %98, %cst_39 [1] : vector<8x20xf32> to vector<8xf32>
    %100 = vector.shape_cast %99 : vector<8xf32> to vector<8x1xf32>
    %cst_40 = arith.constant 5.000000e-02 : f32
    %101 = vector.broadcast %cst_40 : f32 to vector<8x1xf32>
    %102 = arith.mulf %97, %101 : vector<8x1xf32>
    %cst_41 = arith.constant 5.000000e-02 : f32
    %103 = vector.broadcast %cst_41 : f32 to vector<8x1xf32>
    %104 = arith.mulf %100, %103 : vector<8x1xf32>
    %105 = arith.mulf %102, %102 : vector<8x1xf32>
    %106 = arith.subf %104, %105 : vector<8x1xf32>
    %cst_42 = arith.constant 0.000000e+00 : f32
    %107 = vector.broadcast %cst_42 : f32 to vector<8x1xf32>
    %108 = arith.maximumf %106, %107 : vector<8x1xf32>
    %109 = vector.broadcast %102 : vector<8x1xf32> to vector<8x20xf32>
    %110 = arith.subf %95, %109 : vector<8x20xf32>
    %cst_43 = arith.constant 9.99999974E-6 : f32
    %111 = vector.broadcast %cst_43 : f32 to vector<8x1xf32>
    %112 = arith.addf %108, %111 : vector<8x1xf32>
    %113 = math.rsqrt %112 : vector<8x1xf32>
    %114 = vector.broadcast %113 : vector<8x1xf32> to vector<8x20xf32>
    %115 = arith.mulf %110, %114 : vector<8x20xf32>
    %116 = vector.broadcast %86 : vector<1x20xf32> to vector<8x20xf32>
    %117 = arith.mulf %115, %116 : vector<8x20xf32>
    %118 = vector.broadcast %87 : vector<1x20xf32> to vector<8x20xf32>
    %119 = arith.addf %117, %118 : vector<8x20xf32>
    %cst_44 = arith.constant dense<0.000000e+00> : vector<8x40xf32>
    %120 = tpu.matmul %119, %80, %cst_44 {dimension_numbers = #tpu.dot_dimension_numbers<[1], [0], [0], [1], [0, 0, 1, 1], [], []>} : vector<8x20xf32>, vector<20x40xf32>, vector<8x40xf32> -> vector<8x40xf32>
    %121 = vector.broadcast %88 : vector<1x40xf32> to vector<8x40xf32>
    %122 = arith.addf %120, %121 : vector<8x40xf32>
    %cst_45 = arith.constant 0.000000e+00 : f32
    %123 = vector.broadcast %cst_45 : f32 to vector<8x40xf32>
    %124 = arith.maximumf %122, %123 : vector<8x40xf32>
    %cst_46 = arith.constant dense<0.000000e+00> : vector<8x20xf32>
    %125 = tpu.matmul %124, %82, %cst_46 {dimension_numbers = #tpu.dot_dimension_numbers<[1], [0], [0], [1], [0, 0, 1, 1], [], []>} : vector<8x40xf32>, vector<40x20xf32>, vector<8x20xf32> -> vector<8x20xf32>
    %126 = vector.broadcast %89 : vector<1x20xf32> to vector<8x20xf32>
    %127 = arith.addf %125, %126 : vector<8x20xf32>
    %128 = arith.addf %119, %127 : vector<8x20xf32>
    %cst_47 = arith.constant dense<0.000000e+00> : vector<8xf32>
    %129 = vector.multi_reduction <add>, %128, %cst_47 [1] : vector<8x20xf32> to vector<8xf32>
    %130 = vector.shape_cast %129 : vector<8xf32> to vector<8x1xf32>
    %131 = arith.mulf %128, %128 : vector<8x20xf32>
    %cst_48 = arith.constant dense<0.000000e+00> : vector<8xf32>
    %132 = vector.multi_reduction <add>, %131, %cst_48 [1] : vector<8x20xf32> to vector<8xf32>
    %133 = vector.shape_cast %132 : vector<8xf32> to vector<8x1xf32>
    %cst_49 = arith.constant 5.000000e-02 : f32
    %134 = vector.broadcast %cst_49 : f32 to vector<8x1xf32>
    %135 = arith.mulf %130, %134 : vector<8x1xf32>
    %cst_50 = arith.constant 5.000000e-02 : f32
    %136 = vector.broadcast %cst_50 : f32 to vector<8x1xf32>
    %137 = arith.mulf %133, %136 : vector<8x1xf32>
    %138 = arith.mulf %135, %135 : vector<8x1xf32>
    %139 = arith.subf %137, %138 : vector<8x1xf32>
    %cst_51 = arith.constant 0.000000e+00 : f32
    %140 = vector.broadcast %cst_51 : f32 to vector<8x1xf32>
    %141 = arith.maximumf %139, %140 : vector<8x1xf32>
    %142 = vector.broadcast %135 : vector<8x1xf32> to vector<8x20xf32>
    %143 = arith.subf %128, %142 : vector<8x20xf32>
    %cst_52 = arith.constant 9.99999974E-6 : f32
    %144 = vector.broadcast %cst_52 : f32 to vector<8x1xf32>
    %145 = arith.addf %141, %144 : vector<8x1xf32>
    %146 = math.rsqrt %145 : vector<8x1xf32>
    %147 = vector.broadcast %146 : vector<8x1xf32> to vector<8x20xf32>
    %148 = arith.mulf %143, %147 : vector<8x20xf32>
    %149 = vector.broadcast %90 : vector<1x20xf32> to vector<8x20xf32>
    %150 = arith.mulf %148, %149 : vector<8x20xf32>
    %151 = vector.broadcast %91 : vector<1x20xf32> to vector<8x20xf32>
    %152 = arith.addf %150, %151 : vector<8x20xf32>
    %c2 = arith.constant 2 : index
    %c0_53 = arith.constant 0 : index
    %c0_54 = arith.constant 0 : index
    %153 = vector.load %arg2[%c2, %c0_53, %c0_54] : memref<5x88x40xf32, #tpu.memory_space<vmem>>, vector<1x20x20xf32>
    %154 = vector.shape_cast %153 : vector<1x20x20xf32> to vector<20x20xf32>
    %c2_55 = arith.constant 2 : index
    %c24_56 = arith.constant 24 : index
    %c0_57 = arith.constant 0 : index
    %155 = vector.load %arg2[%c2_55, %c24_56, %c0_57] : memref<5x88x40xf32, #tpu.memory_space<vmem>>, vector<1x20x40xf32>
    %156 = vector.shape_cast %155 : vector<1x20x40xf32> to vector<20x40xf32>
    %c2_58 = arith.constant 2 : index
    %c48_59 = arith.constant 48 : index
    %c0_60 = arith.constant 0 : index
    %157 = vector.load %arg2[%c2_58, %c48_59, %c0_60] : memref<5x88x40xf32, #tpu.memory_space<vmem>>, vector<1x40x20xf32>
    %158 = vector.shape_cast %157 : vector<1x40x20xf32> to vector<40x20xf32>
    %c2_61 = arith.constant 2 : index
    %c0_62 = arith.constant 0 : index
    %c0_63 = arith.constant 0 : index
    %159 = vector.load %arg3[%c2_61, %c0_62, %c0_63] : memref<5x8x40xf32, #tpu.memory_space<vmem>>, vector<1x8x40xf32>
    %160 = vector.shape_cast %159 : vector<1x8x40xf32> to vector<8x40xf32>
    %161 = vector.extract_strided_slice %160 {offsets = [0, 0], sizes = [1, 20], strides = [1, 1]} : vector<8x40xf32> to vector<1x20xf32>
    %162 = vector.extract_strided_slice %160 {offsets = [1, 0], sizes = [1, 20], strides = [1, 1]} : vector<8x40xf32> to vector<1x20xf32>
    %163 = vector.extract_strided_slice %160 {offsets = [2, 0], sizes = [1, 20], strides = [1, 1]} : vector<8x40xf32> to vector<1x20xf32>
    %164 = vector.extract_strided_slice %160 {offsets = [3, 0], sizes = [1, 40], strides = [1, 1]} : vector<8x40xf32> to vector<1x40xf32>
    %165 = vector.extract_strided_slice %160 {offsets = [4, 0], sizes = [1, 20], strides = [1, 1]} : vector<8x40xf32> to vector<1x20xf32>
    %166 = vector.extract_strided_slice %160 {offsets = [5, 0], sizes = [1, 20], strides = [1, 1]} : vector<8x40xf32> to vector<1x20xf32>
    %167 = vector.extract_strided_slice %160 {offsets = [6, 0], sizes = [1, 20], strides = [1, 1]} : vector<8x40xf32> to vector<1x20xf32>
    %cst_64 = arith.constant dense<0.000000e+00> : vector<8x20xf32>
    %168 = tpu.matmul %152, %154, %cst_64 {dimension_numbers = #tpu.dot_dimension_numbers<[1], [0], [0], [1], [0, 0, 1, 1], [], []>} : vector<8x20xf32>, vector<20x20xf32>, vector<8x20xf32> -> vector<8x20xf32>
    %169 = vector.broadcast %161 : vector<1x20xf32> to vector<8x20xf32>
    %170 = arith.addf %168, %169 : vector<8x20xf32>
    %171 = arith.addf %152, %170 : vector<8x20xf32>
    %cst_65 = arith.constant dense<0.000000e+00> : vector<8xf32>
    %172 = vector.multi_reduction <add>, %171, %cst_65 [1] : vector<8x20xf32> to vector<8xf32>
    %173 = vector.shape_cast %172 : vector<8xf32> to vector<8x1xf32>
    %174 = arith.mulf %171, %171 : vector<8x20xf32>
    %cst_66 = arith.constant dense<0.000000e+00> : vector<8xf32>
    %175 = vector.multi_reduction <add>, %174, %cst_66 [1] : vector<8x20xf32> to vector<8xf32>
    %176 = vector.shape_cast %175 : vector<8xf32> to vector<8x1xf32>
    %cst_67 = arith.constant 5.000000e-02 : f32
    %177 = vector.broadcast %cst_67 : f32 to vector<8x1xf32>
    %178 = arith.mulf %173, %177 : vector<8x1xf32>
    %cst_68 = arith.constant 5.000000e-02 : f32
    %179 = vector.broadcast %cst_68 : f32 to vector<8x1xf32>
    %180 = arith.mulf %176, %179 : vector<8x1xf32>
    %181 = arith.mulf %178, %178 : vector<8x1xf32>
    %182 = arith.subf %180, %181 : vector<8x1xf32>
    %cst_69 = arith.constant 0.000000e+00 : f32
    %183 = vector.broadcast %cst_69 : f32 to vector<8x1xf32>
    %184 = arith.maximumf %182, %183 : vector<8x1xf32>
    %185 = vector.broadcast %178 : vector<8x1xf32> to vector<8x20xf32>
    %186 = arith.subf %171, %185 : vector<8x20xf32>
    %cst_70 = arith.constant 9.99999974E-6 : f32
    %187 = vector.broadcast %cst_70 : f32 to vector<8x1xf32>
    %188 = arith.addf %184, %187 : vector<8x1xf32>
    %189 = math.rsqrt %188 : vector<8x1xf32>
    %190 = vector.broadcast %189 : vector<8x1xf32> to vector<8x20xf32>
    %191 = arith.mulf %186, %190 : vector<8x20xf32>
    %192 = vector.broadcast %162 : vector<1x20xf32> to vector<8x20xf32>
    %193 = arith.mulf %191, %192 : vector<8x20xf32>
    %194 = vector.broadcast %163 : vector<1x20xf32> to vector<8x20xf32>
    %195 = arith.addf %193, %194 : vector<8x20xf32>
    %cst_71 = arith.constant dense<0.000000e+00> : vector<8x40xf32>
    %196 = tpu.matmul %195, %156, %cst_71 {dimension_numbers = #tpu.dot_dimension_numbers<[1], [0], [0], [1], [0, 0, 1, 1], [], []>} : vector<8x20xf32>, vector<20x40xf32>, vector<8x40xf32> -> vector<8x40xf32>
    %197 = vector.broadcast %164 : vector<1x40xf32> to vector<8x40xf32>
    %198 = arith.addf %196, %197 : vector<8x40xf32>
    %cst_72 = arith.constant 0.000000e+00 : f32
    %199 = vector.broadcast %cst_72 : f32 to vector<8x40xf32>
    %200 = arith.maximumf %198, %199 : vector<8x40xf32>
    %cst_73 = arith.constant dense<0.000000e+00> : vector<8x20xf32>
    %201 = tpu.matmul %200, %158, %cst_73 {dimension_numbers = #tpu.dot_dimension_numbers<[1], [0], [0], [1], [0, 0, 1, 1], [], []>} : vector<8x40xf32>, vector<40x20xf32>, vector<8x20xf32> -> vector<8x20xf32>
    %202 = vector.broadcast %165 : vector<1x20xf32> to vector<8x20xf32>
    %203 = arith.addf %201, %202 : vector<8x20xf32>
    %204 = arith.addf %195, %203 : vector<8x20xf32>
    %cst_74 = arith.constant dense<0.000000e+00> : vector<8xf32>
    %205 = vector.multi_reduction <add>, %204, %cst_74 [1] : vector<8x20xf32> to vector<8xf32>
    %206 = vector.shape_cast %205 : vector<8xf32> to vector<8x1xf32>
    %207 = arith.mulf %204, %204 : vector<8x20xf32>
    %cst_75 = arith.constant dense<0.000000e+00> : vector<8xf32>
    %208 = vector.multi_reduction <add>, %207, %cst_75 [1] : vector<8x20xf32> to vector<8xf32>
    %209 = vector.shape_cast %208 : vector<8xf32> to vector<8x1xf32>
    %cst_76 = arith.constant 5.000000e-02 : f32
    %210 = vector.broadcast %cst_76 : f32 to vector<8x1xf32>
    %211 = arith.mulf %206, %210 : vector<8x1xf32>
    %cst_77 = arith.constant 5.000000e-02 : f32
    %212 = vector.broadcast %cst_77 : f32 to vector<8x1xf32>
    %213 = arith.mulf %209, %212 : vector<8x1xf32>
    %214 = arith.mulf %211, %211 : vector<8x1xf32>
    %215 = arith.subf %213, %214 : vector<8x1xf32>
    %cst_78 = arith.constant 0.000000e+00 : f32
    %216 = vector.broadcast %cst_78 : f32 to vector<8x1xf32>
    %217 = arith.maximumf %215, %216 : vector<8x1xf32>
    %218 = vector.broadcast %211 : vector<8x1xf32> to vector<8x20xf32>
    %219 = arith.subf %204, %218 : vector<8x20xf32>
    %cst_79 = arith.constant 9.99999974E-6 : f32
    %220 = vector.broadcast %cst_79 : f32 to vector<8x1xf32>
    %221 = arith.addf %217, %220 : vector<8x1xf32>
    %222 = math.rsqrt %221 : vector<8x1xf32>
    %223 = vector.broadcast %222 : vector<8x1xf32> to vector<8x20xf32>
    %224 = arith.mulf %219, %223 : vector<8x20xf32>
    %225 = vector.broadcast %166 : vector<1x20xf32> to vector<8x20xf32>
    %226 = arith.mulf %224, %225 : vector<8x20xf32>
    %227 = vector.broadcast %167 : vector<1x20xf32> to vector<8x20xf32>
    %228 = arith.addf %226, %227 : vector<8x20xf32>
    %c3 = arith.constant 3 : index
    %c0_80 = arith.constant 0 : index
    %c0_81 = arith.constant 0 : index
    %229 = vector.load %arg2[%c3, %c0_80, %c0_81] : memref<5x88x40xf32, #tpu.memory_space<vmem>>, vector<1x20x20xf32>
    %230 = vector.shape_cast %229 : vector<1x20x20xf32> to vector<20x20xf32>
    %c3_82 = arith.constant 3 : index
    %c24_83 = arith.constant 24 : index
    %c0_84 = arith.constant 0 : index
    %231 = vector.load %arg2[%c3_82, %c24_83, %c0_84] : memref<5x88x40xf32, #tpu.memory_space<vmem>>, vector<1x20x40xf32>
    %232 = vector.shape_cast %231 : vector<1x20x40xf32> to vector<20x40xf32>
    %c3_85 = arith.constant 3 : index
    %c48_86 = arith.constant 48 : index
    %c0_87 = arith.constant 0 : index
    %233 = vector.load %arg2[%c3_85, %c48_86, %c0_87] : memref<5x88x40xf32, #tpu.memory_space<vmem>>, vector<1x40x20xf32>
    %234 = vector.shape_cast %233 : vector<1x40x20xf32> to vector<40x20xf32>
    %c3_88 = arith.constant 3 : index
    %c0_89 = arith.constant 0 : index
    %c0_90 = arith.constant 0 : index
    %235 = vector.load %arg3[%c3_88, %c0_89, %c0_90] : memref<5x8x40xf32, #tpu.memory_space<vmem>>, vector<1x8x40xf32>
    %236 = vector.shape_cast %235 : vector<1x8x40xf32> to vector<8x40xf32>
    %237 = vector.extract_strided_slice %236 {offsets = [0, 0], sizes = [1, 20], strides = [1, 1]} : vector<8x40xf32> to vector<1x20xf32>
    %238 = vector.extract_strided_slice %236 {offsets = [1, 0], sizes = [1, 20], strides = [1, 1]} : vector<8x40xf32> to vector<1x20xf32>
    %239 = vector.extract_strided_slice %236 {offsets = [2, 0], sizes = [1, 20], strides = [1, 1]} : vector<8x40xf32> to vector<1x20xf32>
    %240 = vector.extract_strided_slice %236 {offsets = [3, 0], sizes = [1, 40], strides = [1, 1]} : vector<8x40xf32> to vector<1x40xf32>
    %241 = vector.extract_strided_slice %236 {offsets = [4, 0], sizes = [1, 20], strides = [1, 1]} : vector<8x40xf32> to vector<1x20xf32>
    %242 = vector.extract_strided_slice %236 {offsets = [5, 0], sizes = [1, 20], strides = [1, 1]} : vector<8x40xf32> to vector<1x20xf32>
    %243 = vector.extract_strided_slice %236 {offsets = [6, 0], sizes = [1, 20], strides = [1, 1]} : vector<8x40xf32> to vector<1x20xf32>
    %cst_91 = arith.constant dense<0.000000e+00> : vector<8x20xf32>
    %244 = tpu.matmul %228, %230, %cst_91 {dimension_numbers = #tpu.dot_dimension_numbers<[1], [0], [0], [1], [0, 0, 1, 1], [], []>} : vector<8x20xf32>, vector<20x20xf32>, vector<8x20xf32> -> vector<8x20xf32>
    %245 = vector.broadcast %237 : vector<1x20xf32> to vector<8x20xf32>
    %246 = arith.addf %244, %245 : vector<8x20xf32>
    %247 = arith.addf %228, %246 : vector<8x20xf32>
    %cst_92 = arith.constant dense<0.000000e+00> : vector<8xf32>
    %248 = vector.multi_reduction <add>, %247, %cst_92 [1] : vector<8x20xf32> to vector<8xf32>
    %249 = vector.shape_cast %248 : vector<8xf32> to vector<8x1xf32>
    %250 = arith.mulf %247, %247 : vector<8x20xf32>
    %cst_93 = arith.constant dense<0.000000e+00> : vector<8xf32>
    %251 = vector.multi_reduction <add>, %250, %cst_93 [1] : vector<8x20xf32> to vector<8xf32>
    %252 = vector.shape_cast %251 : vector<8xf32> to vector<8x1xf32>
    %cst_94 = arith.constant 5.000000e-02 : f32
    %253 = vector.broadcast %cst_94 : f32 to vector<8x1xf32>
    %254 = arith.mulf %249, %253 : vector<8x1xf32>
    %cst_95 = arith.constant 5.000000e-02 : f32
    %255 = vector.broadcast %cst_95 : f32 to vector<8x1xf32>
    %256 = arith.mulf %252, %255 : vector<8x1xf32>
    %257 = arith.mulf %254, %254 : vector<8x1xf32>
    %258 = arith.subf %256, %257 : vector<8x1xf32>
    %cst_96 = arith.constant 0.000000e+00 : f32
    %259 = vector.broadcast %cst_96 : f32 to vector<8x1xf32>
    %260 = arith.maximumf %258, %259 : vector<8x1xf32>
    %261 = vector.broadcast %254 : vector<8x1xf32> to vector<8x20xf32>
    %262 = arith.subf %247, %261 : vector<8x20xf32>
    %cst_97 = arith.constant 9.99999974E-6 : f32
    %263 = vector.broadcast %cst_97 : f32 to vector<8x1xf32>
    %264 = arith.addf %260, %263 : vector<8x1xf32>
    %265 = math.rsqrt %264 : vector<8x1xf32>
    %266 = vector.broadcast %265 : vector<8x1xf32> to vector<8x20xf32>
    %267 = arith.mulf %262, %266 : vector<8x20xf32>
    %268 = vector.broadcast %238 : vector<1x20xf32> to vector<8x20xf32>
    %269 = arith.mulf %267, %268 : vector<8x20xf32>
    %270 = vector.broadcast %239 : vector<1x20xf32> to vector<8x20xf32>
    %271 = arith.addf %269, %270 : vector<8x20xf32>
    %cst_98 = arith.constant dense<0.000000e+00> : vector<8x40xf32>
    %272 = tpu.matmul %271, %232, %cst_98 {dimension_numbers = #tpu.dot_dimension_numbers<[1], [0], [0], [1], [0, 0, 1, 1], [], []>} : vector<8x20xf32>, vector<20x40xf32>, vector<8x40xf32> -> vector<8x40xf32>
    %273 = vector.broadcast %240 : vector<1x40xf32> to vector<8x40xf32>
    %274 = arith.addf %272, %273 : vector<8x40xf32>
    %cst_99 = arith.constant 0.000000e+00 : f32
    %275 = vector.broadcast %cst_99 : f32 to vector<8x40xf32>
    %276 = arith.maximumf %274, %275 : vector<8x40xf32>
    %cst_100 = arith.constant dense<0.000000e+00> : vector<8x20xf32>
    %277 = tpu.matmul %276, %234, %cst_100 {dimension_numbers = #tpu.dot_dimension_numbers<[1], [0], [0], [1], [0, 0, 1, 1], [], []>} : vector<8x40xf32>, vector<40x20xf32>, vector<8x20xf32> -> vector<8x20xf32>
    %278 = vector.broadcast %241 : vector<1x20xf32> to vector<8x20xf32>
    %279 = arith.addf %277, %278 : vector<8x20xf32>
    %280 = arith.addf %271, %279 : vector<8x20xf32>
    %cst_101 = arith.constant dense<0.000000e+00> : vector<8xf32>
    %281 = vector.multi_reduction <add>, %280, %cst_101 [1] : vector<8x20xf32> to vector<8xf32>
    %282 = vector.shape_cast %281 : vector<8xf32> to vector<8x1xf32>
    %283 = arith.mulf %280, %280 : vector<8x20xf32>
    %cst_102 = arith.constant dense<0.000000e+00> : vector<8xf32>
    %284 = vector.multi_reduction <add>, %283, %cst_102 [1] : vector<8x20xf32> to vector<8xf32>
    %285 = vector.shape_cast %284 : vector<8xf32> to vector<8x1xf32>
    %cst_103 = arith.constant 5.000000e-02 : f32
    %286 = vector.broadcast %cst_103 : f32 to vector<8x1xf32>
    %287 = arith.mulf %282, %286 : vector<8x1xf32>
    %cst_104 = arith.constant 5.000000e-02 : f32
    %288 = vector.broadcast %cst_104 : f32 to vector<8x1xf32>
    %289 = arith.mulf %285, %288 : vector<8x1xf32>
    %290 = arith.mulf %287, %287 : vector<8x1xf32>
    %291 = arith.subf %289, %290 : vector<8x1xf32>
    %cst_105 = arith.constant 0.000000e+00 : f32
    %292 = vector.broadcast %cst_105 : f32 to vector<8x1xf32>
    %293 = arith.maximumf %291, %292 : vector<8x1xf32>
    %294 = vector.broadcast %287 : vector<8x1xf32> to vector<8x20xf32>
    %295 = arith.subf %280, %294 : vector<8x20xf32>
    %cst_106 = arith.constant 9.99999974E-6 : f32
    %296 = vector.broadcast %cst_106 : f32 to vector<8x1xf32>
    %297 = arith.addf %293, %296 : vector<8x1xf32>
    %298 = math.rsqrt %297 : vector<8x1xf32>
    %299 = vector.broadcast %298 : vector<8x1xf32> to vector<8x20xf32>
    %300 = arith.mulf %295, %299 : vector<8x20xf32>
    %301 = vector.broadcast %242 : vector<1x20xf32> to vector<8x20xf32>
    %302 = arith.mulf %300, %301 : vector<8x20xf32>
    %303 = vector.broadcast %243 : vector<1x20xf32> to vector<8x20xf32>
    %304 = arith.addf %302, %303 : vector<8x20xf32>
    %c4 = arith.constant 4 : index
    %c0_107 = arith.constant 0 : index
    %c0_108 = arith.constant 0 : index
    %305 = vector.load %arg2[%c4, %c0_107, %c0_108] : memref<5x88x40xf32, #tpu.memory_space<vmem>>, vector<1x20x20xf32>
    %306 = vector.shape_cast %305 : vector<1x20x20xf32> to vector<20x20xf32>
    %c4_109 = arith.constant 4 : index
    %c24_110 = arith.constant 24 : index
    %c0_111 = arith.constant 0 : index
    %307 = vector.load %arg2[%c4_109, %c24_110, %c0_111] : memref<5x88x40xf32, #tpu.memory_space<vmem>>, vector<1x20x40xf32>
    %308 = vector.shape_cast %307 : vector<1x20x40xf32> to vector<20x40xf32>
    %c4_112 = arith.constant 4 : index
    %c48_113 = arith.constant 48 : index
    %c0_114 = arith.constant 0 : index
    %309 = vector.load %arg2[%c4_112, %c48_113, %c0_114] : memref<5x88x40xf32, #tpu.memory_space<vmem>>, vector<1x40x20xf32>
    %310 = vector.shape_cast %309 : vector<1x40x20xf32> to vector<40x20xf32>
    %c4_115 = arith.constant 4 : index
    %c0_116 = arith.constant 0 : index
    %c0_117 = arith.constant 0 : index
    %311 = vector.load %arg3[%c4_115, %c0_116, %c0_117] : memref<5x8x40xf32, #tpu.memory_space<vmem>>, vector<1x8x40xf32>
    %312 = vector.shape_cast %311 : vector<1x8x40xf32> to vector<8x40xf32>
    %313 = vector.extract_strided_slice %312 {offsets = [0, 0], sizes = [1, 20], strides = [1, 1]} : vector<8x40xf32> to vector<1x20xf32>
    %314 = vector.extract_strided_slice %312 {offsets = [1, 0], sizes = [1, 20], strides = [1, 1]} : vector<8x40xf32> to vector<1x20xf32>
    %315 = vector.extract_strided_slice %312 {offsets = [2, 0], sizes = [1, 20], strides = [1, 1]} : vector<8x40xf32> to vector<1x20xf32>
    %316 = vector.extract_strided_slice %312 {offsets = [3, 0], sizes = [1, 40], strides = [1, 1]} : vector<8x40xf32> to vector<1x40xf32>
    %317 = vector.extract_strided_slice %312 {offsets = [4, 0], sizes = [1, 20], strides = [1, 1]} : vector<8x40xf32> to vector<1x20xf32>
    %318 = vector.extract_strided_slice %312 {offsets = [5, 0], sizes = [1, 20], strides = [1, 1]} : vector<8x40xf32> to vector<1x20xf32>
    %319 = vector.extract_strided_slice %312 {offsets = [6, 0], sizes = [1, 20], strides = [1, 1]} : vector<8x40xf32> to vector<1x20xf32>
    %cst_118 = arith.constant dense<0.000000e+00> : vector<8x20xf32>
    %320 = tpu.matmul %304, %306, %cst_118 {dimension_numbers = #tpu.dot_dimension_numbers<[1], [0], [0], [1], [0, 0, 1, 1], [], []>} : vector<8x20xf32>, vector<20x20xf32>, vector<8x20xf32> -> vector<8x20xf32>
    %321 = vector.broadcast %313 : vector<1x20xf32> to vector<8x20xf32>
    %322 = arith.addf %320, %321 : vector<8x20xf32>
    %323 = arith.addf %304, %322 : vector<8x20xf32>
    %cst_119 = arith.constant dense<0.000000e+00> : vector<8xf32>
    %324 = vector.multi_reduction <add>, %323, %cst_119 [1] : vector<8x20xf32> to vector<8xf32>
    %325 = vector.shape_cast %324 : vector<8xf32> to vector<8x1xf32>
    %326 = arith.mulf %323, %323 : vector<8x20xf32>
    %cst_120 = arith.constant dense<0.000000e+00> : vector<8xf32>
    %327 = vector.multi_reduction <add>, %326, %cst_120 [1] : vector<8x20xf32> to vector<8xf32>
    %328 = vector.shape_cast %327 : vector<8xf32> to vector<8x1xf32>
    %cst_121 = arith.constant 5.000000e-02 : f32
    %329 = vector.broadcast %cst_121 : f32 to vector<8x1xf32>
    %330 = arith.mulf %325, %329 : vector<8x1xf32>
    %cst_122 = arith.constant 5.000000e-02 : f32
    %331 = vector.broadcast %cst_122 : f32 to vector<8x1xf32>
    %332 = arith.mulf %328, %331 : vector<8x1xf32>
    %333 = arith.mulf %330, %330 : vector<8x1xf32>
    %334 = arith.subf %332, %333 : vector<8x1xf32>
    %cst_123 = arith.constant 0.000000e+00 : f32
    %335 = vector.broadcast %cst_123 : f32 to vector<8x1xf32>
    %336 = arith.maximumf %334, %335 : vector<8x1xf32>
    %337 = vector.broadcast %330 : vector<8x1xf32> to vector<8x20xf32>
    %338 = arith.subf %323, %337 : vector<8x20xf32>
    %cst_124 = arith.constant 9.99999974E-6 : f32
    %339 = vector.broadcast %cst_124 : f32 to vector<8x1xf32>
    %340 = arith.addf %336, %339 : vector<8x1xf32>
    %341 = math.rsqrt %340 : vector<8x1xf32>
    %342 = vector.broadcast %341 : vector<8x1xf32> to vector<8x20xf32>
    %343 = arith.mulf %338, %342 : vector<8x20xf32>
    %344 = vector.broadcast %314 : vector<1x20xf32> to vector<8x20xf32>
    %345 = arith.mulf %343, %344 : vector<8x20xf32>
    %346 = vector.broadcast %315 : vector<1x20xf32> to vector<8x20xf32>
    %347 = arith.addf %345, %346 : vector<8x20xf32>
    %cst_125 = arith.constant dense<0.000000e+00> : vector<8x40xf32>
    %348 = tpu.matmul %347, %308, %cst_125 {dimension_numbers = #tpu.dot_dimension_numbers<[1], [0], [0], [1], [0, 0, 1, 1], [], []>} : vector<8x20xf32>, vector<20x40xf32>, vector<8x40xf32> -> vector<8x40xf32>
    %349 = vector.broadcast %316 : vector<1x40xf32> to vector<8x40xf32>
    %350 = arith.addf %348, %349 : vector<8x40xf32>
    %cst_126 = arith.constant 0.000000e+00 : f32
    %351 = vector.broadcast %cst_126 : f32 to vector<8x40xf32>
    %352 = arith.maximumf %350, %351 : vector<8x40xf32>
    %cst_127 = arith.constant dense<0.000000e+00> : vector<8x20xf32>
    %353 = tpu.matmul %352, %310, %cst_127 {dimension_numbers = #tpu.dot_dimension_numbers<[1], [0], [0], [1], [0, 0, 1, 1], [], []>} : vector<8x40xf32>, vector<40x20xf32>, vector<8x20xf32> -> vector<8x20xf32>
    %354 = vector.broadcast %317 : vector<1x20xf32> to vector<8x20xf32>
    %355 = arith.addf %353, %354 : vector<8x20xf32>
    %356 = arith.addf %347, %355 : vector<8x20xf32>
    %cst_128 = arith.constant dense<0.000000e+00> : vector<8xf32>
    %357 = vector.multi_reduction <add>, %356, %cst_128 [1] : vector<8x20xf32> to vector<8xf32>
    %358 = vector.shape_cast %357 : vector<8xf32> to vector<8x1xf32>
    %359 = arith.mulf %356, %356 : vector<8x20xf32>
    %cst_129 = arith.constant dense<0.000000e+00> : vector<8xf32>
    %360 = vector.multi_reduction <add>, %359, %cst_129 [1] : vector<8x20xf32> to vector<8xf32>
    %361 = vector.shape_cast %360 : vector<8xf32> to vector<8x1xf32>
    %cst_130 = arith.constant 5.000000e-02 : f32
    %362 = vector.broadcast %cst_130 : f32 to vector<8x1xf32>
    %363 = arith.mulf %358, %362 : vector<8x1xf32>
    %cst_131 = arith.constant 5.000000e-02 : f32
    %364 = vector.broadcast %cst_131 : f32 to vector<8x1xf32>
    %365 = arith.mulf %361, %364 : vector<8x1xf32>
    %366 = arith.mulf %363, %363 : vector<8x1xf32>
    %367 = arith.subf %365, %366 : vector<8x1xf32>
    %cst_132 = arith.constant 0.000000e+00 : f32
    %368 = vector.broadcast %cst_132 : f32 to vector<8x1xf32>
    %369 = arith.maximumf %367, %368 : vector<8x1xf32>
    %370 = vector.broadcast %363 : vector<8x1xf32> to vector<8x20xf32>
    %371 = arith.subf %356, %370 : vector<8x20xf32>
    %cst_133 = arith.constant 9.99999974E-6 : f32
    %372 = vector.broadcast %cst_133 : f32 to vector<8x1xf32>
    %373 = arith.addf %369, %372 : vector<8x1xf32>
    %374 = math.rsqrt %373 : vector<8x1xf32>
    %375 = vector.broadcast %374 : vector<8x1xf32> to vector<8x20xf32>
    %376 = arith.mulf %371, %375 : vector<8x20xf32>
    %377 = vector.broadcast %318 : vector<1x20xf32> to vector<8x20xf32>
    %378 = arith.mulf %376, %377 : vector<8x20xf32>
    %379 = vector.broadcast %319 : vector<1x20xf32> to vector<8x20xf32>
    %380 = arith.addf %378, %379 : vector<8x20xf32>
    %c0_134 = arith.constant 0 : index
    %c0_135 = arith.constant 0 : index
    %381 = vector.load %arg4[%c0_134, %c0_135] : memref<21x8xf32, #tpu.memory_space<vmem>>, vector<20x8xf32>
    %cst_136 = arith.constant dense<0.000000e+00> : vector<8x8xf32>
    %382 = tpu.matmul %380, %381, %cst_136 {dimension_numbers = #tpu.dot_dimension_numbers<[1], [0], [0], [1], [0, 0, 1, 1], [], []>} : vector<8x20xf32>, vector<20x8xf32>, vector<8x8xf32> -> vector<8x8xf32>
    %c20 = arith.constant 20 : index
    %c0_137 = arith.constant 0 : index
    %383 = vector.load %arg4[%c20, %c0_137] : memref<21x8xf32, #tpu.memory_space<vmem>>, vector<1x8xf32>
    %384 = vector.broadcast %383 : vector<1x8xf32> to vector<8x8xf32>
    %385 = arith.addf %382, %384 : vector<8x8xf32>
    %c0_138 = arith.constant 0 : index
    %c0_139 = arith.constant 0 : index
    %386 = vector.load %arg5[%c0_138, %c0_139] : memref<8x8xf32, #tpu.memory_space<vmem>>, vector<8x8xf32>
    tpu.vector_store %arg5[%c0_138, %c0_139], %385 {strides = array<i32>} : memref<8x8xf32, #tpu.memory_space<vmem>>, vector<8x8xf32>,
    return
  }
  func.func @transform_0(%arg0: i32) -> (i32, i32) {
    %c0_i32 = arith.constant 0 : i32
    %c0_i32_0 = arith.constant 0 : i32
    return %arg0, %c0_i32 : i32, i32
  }
  func.func @transform_1(%arg0: i32) -> (i32, i32, i32) {
    %c0_i32 = arith.constant 0 : i32
    %c0_i32_0 = arith.constant 0 : i32
    %c0_i32_1 = arith.constant 0 : i32
    %c0_i32_2 = arith.constant 0 : i32
    return %c0_i32, %c0_i32_0, %c0_i32_1 : i32, i32, i32
  }
  func.func @transform_2(%arg0: i32) -> (i32, i32, i32) {
    %c0_i32 = arith.constant 0 : i32
    %c0_i32_0 = arith.constant 0 : i32
    %c0_i32_1 = arith.constant 0 : i32
    %c0_i32_2 = arith.constant 0 : i32
    return %c0_i32, %c0_i32_0, %c0_i32_1 : i32, i32, i32
  }
  func.func @transform_3(%arg0: i32) -> (i32, i32) {
    %c0_i32 = arith.constant 0 : i32
    %c0_i32_0 = arith.constant 0 : i32
    %c0_i32_1 = arith.constant 0 : i32
    return %c0_i32, %c0_i32_0 : i32, i32
  }
  func.func @transform_4(%arg0: i32) -> (i32, i32) {
    %c0_i32 = arith.constant 0 : i32
    %c0_i32_0 = arith.constant 0 : i32
    return %arg0, %c0_i32 : i32, i32
  }
}

</mosaic_0001>

<bundles_post_ra>
// kernel: realformer_forward.1
= control target key start
LH: loop header
LB: loop body
LE: loop exit
PB: predicated region body
PF: predicated region fallthrough
CT: control target
= control target key end

     0   :  { %vm38_vm0 = vcmask 1043456   ;;  %v1975_v0 = vmov 0.0   ;;  %vm1976_vm1 = vmmov 0   ;;  %vm34_vm2 = vcmask 162816   ;;  %s2440_s1 = inlined_call_operand.vmem [shape: f32[5,88,40], index: 1, kind: input, shape index: {}]   ;;  %s2441_s0 = inlined_call_operand.vmem [shape: f32[8,20], index: 0, kind: input, shape index: {}]   ;;  %s2442_s2 = inlined_call_operand.vmem [shape: f32[5,8,40], index: 2, kind: input, shape index: {}]   ;;  %s2443_s3 = inlined_call_operand.vmem [shape: f32[21,8], index: 3, kind: input, shape index: {}]   ;;  %s2444_s4 = inlined_call_operand.vmem [shape: f32[8,8], index: 4, kind: output, shape index: {}]  }
   0x1   :  { %1789 = vmatprep.subr.mxu0 %v1975_v0  ;;  %v20_v1 = vld [vmem:[%s2440_s1 + $0x10] sm:$0xf]  ;;  %v19_v2 = vld [vmem:[%s2440_s1 + $0x8] sm:$0xff]  ;;  %1795 = vmatprep.mubr.msk.f32.mxu0 %vm1976_vm1, %v1975_v0  ;;  %v18_v3 = vld [vmem:[%s2440_s1] sm:$0xff]  ;;  %v30_v5 = vlaneseq  ;;  %vm224_vm3 = vcmask 326656   ;;  %vm1633_vm4 = vcmask 64512  }
   0x2   :  { %1790 = vmatpush3.msk.msra.mxu0 %vm38_vm0, %v20_v1  ;;  %1798 = vmatprep.subr.mxu1 %v1975_v0  ;;  %v17_v4 = vld [vmem:[%s2441_s0] sm:$0xff]  ;;  %v23_v17 = vld [vmem:[%s2440_s1 + $0x28] sm:$0xf]  ;;  %v21_v19 = vld [vmem:[%s2440_s1 + $0x18] sm:$0xff] }
   0x3   :  { %1791 = vmatprep.subr.mxu0 %v1975_v0  ;;  %1804 = vmatprep.mubr.msk.f32.mxu1 %vm1976_vm1, %v1975_v0  ;;  %v2027_v6 = vshrl.u32 %v30_v5, 7  ;;  %v2035_v8 = vld [vmem:[%s2442_s2] sm:$0xff]  ;;  %v28_v20 = vld [vmem:[%s2440_s1 + $0x50] sm:$0xff]  ;;  %v27_v21 = vld [vmem:[%s2440_s1 + $0x48] sm:$0xff] }
   0x4   :  { %1792 = vmatpush3.msra.mxu0 %v19_v2  ;;  %v22_v18 = vld [vmem:[%s2440_s1 + $0x20] sm:$0xff]  ;;  %1799 = vmatpush3.msk.msra.mxu1 %vm38_vm0, %v23_v17  ;;  %v25_v40 = vld [vmem:[%s2440_s1 + $0x38] sm:$0xff]  ;;  %v24_v41 = vld [vmem:[%s2440_s1 + $0x30] sm:$0xff] }
   0x5   :  { %1793 = vmatprep.subr.mxu0 %v1975_v0  ;;  %v2030_v7 = vsub.s32 0, %v2027_v6  ;;  %1800 = vmatprep.subr.mxu1 %v1975_v0  ;;  %v2063_v30 = vsub.s32 1, %v2027_v6  ;;  %v2066_v31 = vsub.s32 2, %v2027_v6  ;;  %v26_v39 = vld [vmem:[%s2440_s1 + $0x40] sm:$0xff]  ;;  %v2088_v42 = vsub.s32 3, %v2027_v6  ;;  %v1644_v59 = vld [vmem:[%s2440_s1 + $0x58] sm:$0xff] }
   0x6   :  { %1794 = vmatpush3.msra.mxu0 %v18_v3  ;;  %1801 = vmatpush3.msra.mxu1 %v22_v18  ;;  %v2096_v48 = vsub.s32 4, %v2027_v6  ;;  %v1646_v57 = vld [vmem:[%s2440_s1 + $0x68] sm:$0xf]  ;;  %v1645_v58 = vld [vmem:[%s2440_s1 + $0x60] sm:$0xff]  ;;  %v2116_v5 = vsub.s32 5, %v2027_v6 }
   0x7   :  { %1796 = vmatmul.mubr.msk.f32.vlgmr.msra.gmra.mxu0 %vm34_vm2, %v17_v4  ;;  %1807 = vmatprep.subr.mxu0 %v1975_v0  ;;  %v33_v9 = vrot.slane %v2035_v8, %v2030_v7  ;;  %v132_v33 = vrot.slane %v2035_v8, %v2063_v30  ;;  %v137_v36 = vrot.slane %v2035_v8, %v2066_v31 }
   0x8   :  { %1817 = vmatprep.mubr.msk.f32.mxu0 %vm1976_vm1, %v1975_v0  ;;  %1802 = vmatprep.subr.mxu1 %v1975_v0  ;;  %v142_v43 = vrot.slane %v2035_v8, %v2088_v42  ;;  %v223_v49 = vrot.slane %v2035_v8, %v2096_v48 }
   0x9   :  { %1803 = vmatpush3.msra.mxu1 %v21_v19  ;;  %1808 = vmatpush3.msra.mxu0 %v28_v20 }
   0xa   :  { %1820 = vmatprep.subr.mxu1 %v1975_v0  ;;  %1809 = vmatprep.subr.mxu0 %v1975_v0 }
   0xb   :  { %1810 = vmatpush3.msra.mxu0 %v27_v21 }
   0xc   :  { %1811 = vmatprep.subr.mxu0 %v1975_v0 }
   0xd   :  { %1812 = vmatpush3.msra.mxu0 %v26_v39 }
   0xe   :  { %1813 = vmatprep.subr.mxu0 %v1975_v0 }
   0xf   :  { %1814 = vmatpush3.msra.mxu0 %v25_v40 }
  0x10   :  { %1815 = vmatprep.subr.mxu0 %v1975_v0 }
  0x11   :  { %1816 = vmatpush3.msra.mxu0 %v24_v41 }
  0x12   :  { %1838 = vmatprep.subr.mxu0 %v1975_v0 }
  0xc7   :  { %v108_v10 = vpop.f32.mrf.mxu0 }
  0xc8   :  { %v109_v11 = vadd.f32 %v108_v10, %v33_v9  ;;  %v2119_v9 = vsub.s32 6, %v2027_v6  ;;  %v2131_v6 = vld [vmem:[%s2442_s2 + $0x8] sm:$0xff] }
  0xc9   :  { %v1797_v12 = vpop.f32.mrf.mxu0  ;;  %v342_v17 = vrot.slane %v2131_v6, %v2030_v7  ;;  %v439_v40 = vrot.slane %v2131_v6, %v2063_v30 }
  0xca   :  { %v112_v13 = vadd.f32 %v109_v11, %v17_v4  ;;  %v318_v11 = vrot.slane %v2035_v8, %v2116_v5 }
  0xcc   :  { %v113_v14 = vsel %vm34_vm2, %v112_v13, 0.0  ;;  %v116_v15 = vmul.f32 %v112_v13, %v112_v13 }
  0xcd   :  { %114 = vadd.xlane.f32.xlu0 %v113_v14  ;;  %v323_v14 = vrot.slane %v2035_v8, %v2119_v9 }
  0xce   :  { %v117_v16 = vsel %vm34_vm2, %v116_v15, 0.0 }
  0xd1   :  { %118 = vadd.xlane.f32.xlu0 %v117_v16 }
 0x156   :  { %v115_v22 = vpop.xlane.xlu0 %114 }
 0x157   :  { %v120_v23 = vmul.f32 0.05, %v115_v22 }
 0x159   :  { %v122_v25 = vmul.f32 %v120_v23, %v120_v23  ;;  %v125_v32 = vsub.f32 %v112_v13, %v120_v23 }
 0x15a   :  { %v119_v24 = vpop.xlane.xlu0 %118 }
 0x15b   :  { %v121_v26 = vmul.f32 0.05, %v119_v24  ;;  %v1649_v24 = vld [vmem:[%s2440_s1 + $0x80] sm:$0xf] }
 0x15d   :  { %v123_v27 = vsub.f32 %v121_v26, %v122_v25  ;;  %v1648_v25 = vld [vmem:[%s2440_s1 + $0x78] sm:$0xff]  ;;  %v1647_v26 = vld [vmem:[%s2440_s1 + $0x70] sm:$0xff] }
 0x15f   :  { %v124_v28 = vmax.f32 %v123_v27, 0.0  ;;  %v1654_v27 = vld [vmem:[%s2440_s1 + $0xa8] sm:$0xff] }
 0x161   :  { %v126_v29 = vadd.f32 1e-05, %v124_v28  ;;  %v1653_v28 = vld [vmem:[%s2440_s1 + $0xa0] sm:$0xff] }
 0x163   :  { %1955 = vrsqrt.f32 %v126_v29 }
 0x170   :  { %v1956_v34 = vpop.eup %1955 }
 0x171   :  { %v128_v35 = vmul.f32 %v1956_v34, %v125_v32 }
 0x173   :  { %v133_v37 = vmul.f32 %v132_v33, %v128_v35 }
 0x175   :  { %v138_v38 = vadd.f32 %v137_v36, %v133_v37 }
 0x177   :  { %1805 = vmatmul.mubr.msk.f32.vlgmr.msra.gmra.mxu1 %vm34_vm2, %v138_v38 }
 0x178   :  { %1826 = vmatprep.mubr.msk.f32.mxu1 %vm1976_vm1, %v1975_v0  ;;  %1821 = vmatpush3.msk.msra.mxu1 %vm38_vm0, %v1646_v57 }
 0x179   :  { %1822 = vmatprep.subr.mxu1 %v1975_v0 }
 0x17a   :  { %1823 = vmatpush3.msra.mxu1 %v1645_v58 }
 0x17b   :  { %1824 = vmatprep.subr.mxu1 %v1975_v0 }
 0x17c   :  { %1825 = vmatpush3.msra.mxu1 %v1644_v59 }
 0x17d   :  { %1829 = vmatprep.subr.mxu1 %v1975_v0 }
 0x237   :  { %v215_v44 = vpop.f32.mrf.mxu1 }
 0x238   :  { %v216_v45 = vadd.f32 %v215_v44, %v142_v43  ;;  %v444_v44 = vrot.slane %v2131_v6, %v2066_v31 }
 0x239   :  { %v1806_v46 = vpop.f32.mrf.mxu1 }
 0x23a   :  { %v219_v47 = vmax.f32 %v216_v45, 0.0 }
 0x23c   :  { %1818 = vmatmul.mubr.msk.f32.vlgmr.msra.gmra.mxu0 %vm224_vm3, %v219_v47  ;;  %v1652_v47 = vld [vmem:[%s2440_s1 + $0x98] sm:$0xff] }
 0x23d   :  { %1848 = vmatprep.mubr.msk.f32.mxu0 %vm1976_vm1, %v1975_v0  ;;  %1839 = vmatpush3.msra.mxu0 %v1654_v27 }
 0x23e   :  { %1840 = vmatprep.subr.mxu0 %v1975_v0 }
 0x23f   :  { %1841 = vmatpush3.msra.mxu0 %v1653_v28 }
 0x240   :  { %1842 = vmatprep.subr.mxu0 %v1975_v0 }
 0x241   :  { %1843 = vmatpush3.msra.mxu0 %v1652_v47 }
 0x242   :  { %1844 = vmatprep.subr.mxu0 %v1975_v0 }
 0x2fc   :  { %v294_v50 = vpop.f32.mrf.mxu0 }
 0x2fd   :  { %v295_v51 = vadd.f32 %v294_v50, %v223_v49  ;;  %v1651_v49 = vld [vmem:[%s2440_s1 + $0x90] sm:$0xff]  ;;  %v1650_v50 = vld [vmem:[%s2440_s1 + $0x88] sm:$0xff] }
 0x2fe   :  { %v1819_v52 = vpop.f32.mrf.mxu0  ;;  %1845 = vmatpush3.msra.mxu0 %v1651_v49 }
 0x2ff   :  { %v298_v53 = vadd.f32 %v295_v51, %v138_v38  ;;  %1846 = vmatprep.subr.mxu0 %v1975_v0  ;;  %v449_v51 = vrot.slane %v2131_v6, %v2088_v42 }
 0x300   :  { %1847 = vmatpush3.msra.mxu0 %v1650_v50 }
 0x301   :  { %v299_v54 = vsel %vm34_vm2, %v298_v53, 0.0  ;;  %v302_v55 = vmul.f32 %v298_v53, %v298_v53  ;;  %1869 = vmatprep.subr.mxu0 %v1975_v0 }
 0x302   :  { %300 = vadd.xlane.f32.xlu1 %v299_v54 }
 0x303   :  { %v303_v56 = vsel %vm34_vm2, %v302_v55, 0.0 }
 0x306   :  { %304 = vadd.xlane.f32.xlu1 %v303_v56  ;;  %v530_v56 = vrot.slane %v2131_v6, %v2096_v48 }
 0x38b   :  { %v301_v60 = vpop.xlane.xlu1 %300 }
 0x38c   :  { %v306_v61 = vmul.f32 0.05, %v301_v60 }
 0x38e   :  { %v308_v63 = vmul.f32 %v306_v61, %v306_v61  ;;  %v311_v10 = vsub.f32 %v298_v53, %v306_v61 }
 0x38f   :  { %v305_v62 = vpop.xlane.xlu1 %304 }
 0x390   :  { %v307_v1 = vmul.f32 0.05, %v305_v62 }
 0x392   :  { %v309_v2 = vsub.f32 %v307_v1, %v308_v63  ;;  %v1663_v1 = vld [vmem:[%s2440_s1 + $0xc0] sm:$0xf] }
 0x394   :  { %v310_v3 = vmax.f32 %v309_v2, 0.0  ;;  %v1662_v2 = vld [vmem:[%s2440_s1 + $0xb8] sm:$0xff] }
 0x396   :  { %v312_v4 = vadd.f32 1e-05, %v310_v3  ;;  %v1661_v3 = vld [vmem:[%s2440_s1 + $0xb0] sm:$0xff] }
 0x398   :  { %1957 = vrsqrt.f32 %v312_v4 }
 0x3a5   :  { %v1958_v12 = vpop.eup %1957 }
 0x3a6   :  { %v314_v13 = vmul.f32 %v1958_v12, %v311_v10 }
 0x3a8   :  { %v319_v15 = vmul.f32 %v318_v11, %v314_v13 }
 0x3aa   :  { %v324_v16 = vadd.f32 %v323_v14, %v319_v15 }
 0x3ac   :  { %1827 = vmatmul.mubr.msk.f32.vlgmr.msra.gmra.mxu1 %vm34_vm2, %v324_v16 }
 0x3ad   :  { %1835 = vmatprep.mubr.msk.f32.mxu1 %vm1976_vm1, %v1975_v0  ;;  %1830 = vmatpush3.msk.msra.mxu1 %vm38_vm0, %v1649_v24 }
 0x3ae   :  { %1831 = vmatprep.subr.mxu1 %v1975_v0 }
 0x3af   :  { %1832 = vmatpush3.msra.mxu1 %v1648_v25 }
 0x3b0   :  { %1833 = vmatprep.subr.mxu1 %v1975_v0 }
 0x3b1   :  { %1834 = vmatpush3.msra.mxu1 %v1647_v26 }
 0x3b2   :  { %1851 = vmatprep.subr.mxu1 %v1975_v0 }
 0x46c   :  { %v415_v18 = vpop.f32.mrf.mxu1 }
 0x46d   :  { %v416_v19 = vadd.f32 %v415_v18, %v342_v17  ;;  %v624_v18 = vrot.slane %v2131_v6, %v2116_v5 }
 0x46e   :  { %v1828_v20 = vpop.f32.mrf.mxu1 }
 0x46f   :  { %v419_v21 = vadd.f32 %v416_v19, %v324_v16 }
 0x471   :  { %v420_v8 = vsel %vm34_vm2, %v419_v21, 0.0  ;;  %v423_v22 = vmul.f32 %v419_v21, %v419_v21 }
 0x472   :  { %421 = vadd.xlane.f32.xlu0 %v420_v8 }
 0x473   :  { %v424_v23 = vsel %vm34_vm2, %v423_v22, 0.0 }
 0x474   :  { %425 = vadd.xlane.f32.xlu1 %v424_v23  ;;  %v2209_v23 = vld [vmem:[%s2442_s2 + $0x10] sm:$0xff] }
 0x475   :  { %v648_v24 = vrot.slane %v2209_v23, %v2030_v7  ;;  %v745_v49 = vrot.slane %v2209_v23, %v2063_v30 }
 0x4fb   :  { %v422_v29 = vpop.xlane.xlu0 %421 }
 0x4fc   :  { %v427_v32 = vmul.f32 0.05, %v422_v29 }
 0x4fd   :  { %v426_v33 = vpop.xlane.xlu1 %425 }
 0x4fe   :  { %v429_v34 = vmul.f32 %v427_v32, %v427_v32  ;;  %v428_v35 = vmul.f32 0.05, %v426_v33  ;;  %v432_v39 = vsub.f32 %v419_v21, %v427_v32  ;;  %v629_v21 = vrot.slane %v2131_v6, %v2119_v9  ;;  %v1666_v33 = vld [vmem:[%s2440_s1 + $0xd8] sm:$0xf] }
 0x500   :  { %v430_v36 = vsub.f32 %v428_v35, %v429_v34  ;;  %v1665_v34 = vld [vmem:[%s2440_s1 + $0xd0] sm:$0xff]  ;;  %v1664_v35 = vld [vmem:[%s2440_s1 + $0xc8] sm:$0xff] }
 0x502   :  { %v431_v37 = vmax.f32 %v430_v36, 0.0  ;;  %v1671_v36 = vld [vmem:[%s2440_s1 + $0x100] sm:$0xff] }
 0x504   :  { %v433_v38 = vadd.f32 1e-05, %v431_v37  ;;  %v1670_v37 = vld [vmem:[%s2440_s1 + $0xf8] sm:$0xff] }
 0x506   :  { %1959 = vrsqrt.f32 %v433_v38 }
 0x513   :  { %v1960_v41 = vpop.eup %1959 }
 0x514   :  { %v435_v43 = vmul.f32 %v1960_v41, %v432_v39 }
 0x516   :  { %v440_v45 = vmul.f32 %v439_v40, %v435_v43 }
 0x518   :  { %v445_v46 = vadd.f32 %v444_v44, %v440_v45 }
 0x51a   :  { %1836 = vmatmul.mubr.msk.f32.vlgmr.msra.gmra.mxu1 %vm34_vm2, %v445_v46 }
 0x51b   :  { %1857 = vmatprep.mubr.msk.f32.mxu1 %vm1976_vm1, %v1975_v0  ;;  %1852 = vmatpush3.msk.msra.mxu1 %vm38_vm0, %v1663_v1 }
 0x51c   :  { %1853 = vmatprep.subr.mxu1 %v1975_v0 }
 0x51d   :  { %1854 = vmatpush3.msra.mxu1 %v1662_v2 }
 0x51e   :  { %1855 = vmatprep.subr.mxu1 %v1975_v0 }
 0x51f   :  { %1856 = vmatpush3.msra.mxu1 %v1661_v3 }
 0x520   :  { %1860 = vmatprep.subr.mxu1 %v1975_v0 }
 0x5da   :  { %v522_v52 = vpop.f32.mrf.mxu1 }
 0x5db   :  { %v523_v53 = vadd.f32 %v522_v52, %v449_v51  ;;  %v750_v52 = vrot.slane %v2209_v23, %v2066_v31 }
 0x5dc   :  { %v1837_v54 = vpop.f32.mrf.mxu1 }
 0x5dd   :  { %v526_v55 = vmax.f32 %v523_v53, 0.0 }
 0x5df   :  { %1849 = vmatmul.mubr.msk.f32.vlgmr.msra.gmra.mxu0 %vm224_vm3, %v526_v55  ;;  %v1669_v55 = vld [vmem:[%s2440_s1 + $0xf0] sm:$0xff] }
 0x5e0   :  { %1879 = vmatprep.mubr.msk.f32.mxu0 %vm1976_vm1, %v1975_v0  ;;  %1870 = vmatpush3.msra.mxu0 %v1671_v36 }
 0x5e1   :  { %1871 = vmatprep.subr.mxu0 %v1975_v0 }
 0x5e2   :  { %1872 = vmatpush3.msra.mxu0 %v1670_v37 }
 0x5e3   :  { %1873 = vmatprep.subr.mxu0 %v1975_v0 }
 0x5e4   :  { %1874 = vmatpush3.msra.mxu0 %v1669_v55 }
 0x5e5   :  { %1875 = vmatprep.subr.mxu0 %v1975_v0 }
 0x69f   :  { %v600_v57 = vpop.f32.mrf.mxu0 }
 0x6a0   :  { %v601_v58 = vadd.f32 %v600_v57, %v530_v56  ;;  %v1668_v56 = vld [vmem:[%s2440_s1 + $0xe8] sm:$0xff]  ;;  %v1667_v57 = vld [vmem:[%s2440_s1 + $0xe0] sm:$0xff] }
 0x6a1   :  { %v1850_v59 = vpop.f32.mrf.mxu0  ;;  %1876 = vmatpush3.msra.mxu0 %v1668_v56 }
 0x6a2   :  { %v604_v60 = vadd.f32 %v601_v58, %v445_v46  ;;  %1877 = vmatprep.subr.mxu0 %v1975_v0  ;;  %v755_v58 = vrot.slane %v2209_v23, %v2088_v42 }
 0x6a3   :  { %1878 = vmatpush3.msra.mxu0 %v1667_v57 }
 0x6a4   :  { %v605_v61 = vsel %vm34_vm2, %v604_v60, 0.0  ;;  %v608_v62 = vmul.f32 %v604_v60, %v604_v60  ;;  %1891 = vmatprep.subr.mxu0 %v1975_v0 }
 0x6a5   :  { %606 = vadd.xlane.f32.xlu0 %v605_v61 }
 0x6a6   :  { %v609_v63 = vsel %vm34_vm2, %v608_v62, 0.0 }
 0x6a7   :  { %610 = vadd.xlane.f32.xlu1 %v609_v63  ;;  %v836_v63 = vrot.slane %v2209_v23, %v2096_v48 }
 0x72e   :  { %v607_v4 = vpop.xlane.xlu0 %606 }
 0x72f   :  { %v612_v10 = vmul.f32 0.05, %v607_v4 }
 0x730   :  { %v611_v11 = vpop.xlane.xlu1 %610 }
 0x731   :  { %v614_v12 = vmul.f32 %v612_v10, %v612_v10  ;;  %v613_v13 = vmul.f32 0.05, %v611_v11  ;;  %v617_v17 = vsub.f32 %v604_v60, %v612_v10 }
 0x733   :  { %v615_v14 = vsub.f32 %v613_v13, %v614_v12  ;;  %v1680_v13 = vld [vmem:[%s2440_s1 + $0x118] sm:$0xf] }
 0x735   :  { %v616_v15 = vmax.f32 %v615_v14, 0.0  ;;  %v1679_v14 = vld [vmem:[%s2440_s1 + $0x110] sm:$0xff] }
 0x737   :  { %v618_v16 = vadd.f32 1e-05, %v616_v15  ;;  %v1678_v15 = vld [vmem:[%s2440_s1 + $0x108] sm:$0xff] }
 0x739   :  { %1961 = vrsqrt.f32 %v618_v16 }
 0x746   :  { %v1962_v19 = vpop.eup %1961 }
 0x747   :  { %v620_v20 = vmul.f32 %v1962_v19, %v617_v17 }
 0x749   :  { %v625_v8 = vmul.f32 %v624_v18, %v620_v20 }
 0x74b   :  { %v630_v22 = vadd.f32 %v629_v21, %v625_v8 }
 0x74d   :  { %1858 = vmatmul.mubr.msk.f32.vlgmr.msra.gmra.mxu1 %vm34_vm2, %v630_v22 }
 0x74e   :  { %1866 = vmatprep.mubr.msk.f32.mxu1 %vm1976_vm1, %v1975_v0  ;;  %1861 = vmatpush3.msk.msra.mxu1 %vm38_vm0, %v1666_v33 }
 0x74f   :  { %1862 = vmatprep.subr.mxu1 %v1975_v0 }
 0x750   :  { %1863 = vmatpush3.msra.mxu1 %v1665_v34 }
 0x751   :  { %1864 = vmatprep.subr.mxu1 %v1975_v0 }
 0x752   :  { %1865 = vmatpush3.msra.mxu1 %v1664_v35 }
 0x753   :  { %1882 = vmatprep.subr.mxu1 %v1975_v0 }
 0x80d   :  { %v721_v25 = vpop.f32.mrf.mxu1 }
 0x80e   :  { %v722_v26 = vadd.f32 %v721_v25, %v648_v24  ;;  %v930_v25 = vrot.slane %v2209_v23, %v2116_v5 }
 0x80f   :  { %v1859_v27 = vpop.f32.mrf.mxu1 }
 0x810   :  { %v725_v28 = vadd.f32 %v722_v26, %v630_v22 }
 0x812   :  { %v726_v6 = vsel %vm34_vm2, %v725_v28, 0.0  ;;  %v729_v29 = vmul.f32 %v725_v28, %v725_v28 }
 0x813   :  { %727 = vadd.xlane.f32.xlu0 %v726_v6 }
 0x814   :  { %v730_v32 = vsel %vm34_vm2, %v729_v29, 0.0 }
 0x815   :  { %731 = vadd.xlane.f32.xlu1 %v730_v32  ;;  %v2287_v32 = vld [vmem:[%s2442_s2 + $0x18] sm:$0xff] }
 0x816   :  { %v954_v33 = vrot.slane %v2287_v32, %v2030_v7  ;;  %v1051_v56 = vrot.slane %v2287_v32, %v2063_v30 }
 0x89c   :  { %v728_v38 = vpop.xlane.xlu0 %727 }
 0x89d   :  { %v733_v39 = vmul.f32 0.05, %v728_v38 }
 0x89e   :  { %v732_v40 = vpop.xlane.xlu1 %731 }
 0x89f   :  { %v735_v41 = vmul.f32 %v733_v39, %v733_v39  ;;  %v734_v43 = vmul.f32 0.05, %v732_v40  ;;  %v738_v47 = vsub.f32 %v725_v28, %v733_v39  ;;  %v935_v28 = vrot.slane %v2209_v23, %v2119_v9  ;;  %v1683_v40 = vld [vmem:[%s2440_s1 + $0x130] sm:$0xf] }
 0x8a1   :  { %v736_v44 = vsub.f32 %v734_v43, %v735_v41  ;;  %v1682_v41 = vld [vmem:[%s2440_s1 + $0x128] sm:$0xff]  ;;  %v1681_v43 = vld [vmem:[%s2440_s1 + $0x120] sm:$0xff] }
 0x8a3   :  { %v737_v45 = vmax.f32 %v736_v44, 0.0  ;;  %v1688_v44 = vld [vmem:[%s2440_s1 + $0x158] sm:$0xff] }
 0x8a5   :  { %v739_v46 = vadd.f32 1e-05, %v737_v45  ;;  %v1687_v45 = vld [vmem:[%s2440_s1 + $0x150] sm:$0xff] }
 0x8a7   :  { %1963 = vrsqrt.f32 %v739_v46 }
 0x8b4   :  { %v1964_v50 = vpop.eup %1963 }
 0x8b5   :  { %v741_v51 = vmul.f32 %v1964_v50, %v738_v47 }
 0x8b7   :  { %v746_v53 = vmul.f32 %v745_v49, %v741_v51 }
 0x8b9   :  { %v751_v54 = vadd.f32 %v750_v52, %v746_v53 }
 0x8bb   :  { %1867 = vmatmul.mubr.msk.f32.vlgmr.msra.gmra.mxu1 %vm34_vm2, %v751_v54 }
 0x8bc   :  { %1888 = vmatprep.mubr.msk.f32.mxu1 %vm1976_vm1, %v1975_v0  ;;  %1883 = vmatpush3.msk.msra.mxu1 %vm38_vm0, %v1680_v13 }
 0x8bd   :  { %1884 = vmatprep.subr.mxu1 %v1975_v0 }
 0x8be   :  { %1885 = vmatpush3.msra.mxu1 %v1679_v14 }
 0x8bf   :  { %1886 = vmatprep.subr.mxu1 %v1975_v0 }
 0x8c0   :  { %1887 = vmatpush3.msra.mxu1 %v1678_v15 }
 0x8c1   :  { %1900 = vmatprep.subr.mxu1 %v1975_v0 }
 0x97b   :  { %v828_v59 = vpop.f32.mrf.mxu1 }
 0x97c   :  { %v829_v60 = vadd.f32 %v828_v59, %v755_v58  ;;  %v1056_v59 = vrot.slane %v2287_v32, %v2066_v31 }
 0x97d   :  { %v1868_v61 = vpop.f32.mrf.mxu1 }
 0x97e   :  { %v832_v62 = vmax.f32 %v829_v60, 0.0 }
 0x980   :  { %1880 = vmatmul.mubr.msk.f32.vlgmr.msra.gmra.mxu0 %vm224_vm3, %v832_v62  ;;  %v1686_v62 = vld [vmem:[%s2440_s1 + $0x148] sm:$0xff] }
 0x981   :  { %1897 = vmatprep.mubr.msk.f32.mxu0 %vm1976_vm1, %v1975_v0  ;;  %1892 = vmatpush3.msk.msra.mxu0 %vm38_vm0, %v1683_v40 }
 0x982   :  { %1893 = vmatprep.subr.mxu0 %v1975_v0 }
 0x983   :  { %1894 = vmatpush3.msra.mxu0 %v1682_v41 }
 0x984   :  { %1895 = vmatprep.subr.mxu0 %v1975_v0 }
 0x985   :  { %1896 = vmatpush3.msra.mxu0 %v1681_v43 }
 0x986   :  { %1913 = vmatprep.subr.mxu0 %v1975_v0 }
 0xa40   :  { %v906_v1 = vpop.f32.mrf.mxu0 }
 0xa41   :  { %v907_v2 = vadd.f32 %v906_v1, %v836_v63  ;;  %v1685_v63 = vld [vmem:[%s2440_s1 + $0x140] sm:$0xff]  ;;  %v1684_v1 = vld [vmem:[%s2440_s1 + $0x138] sm:$0xff] }
 0xa42   :  { %v1881_v3 = vpop.f32.mrf.mxu0 }
 0xa43   :  { %v910_v4 = vadd.f32 %v907_v2, %v751_v54  ;;  %v1061_v2 = vrot.slane %v2287_v32, %v2088_v42 }
 0xa45   :  { %v911_v10 = vsel %vm34_vm2, %v910_v4, 0.0  ;;  %v914_v11 = vmul.f32 %v910_v4, %v910_v4 }
 0xa46   :  { %912 = vadd.xlane.f32.xlu0 %v911_v10 }
 0xa47   :  { %v915_v12 = vsel %vm34_vm2, %v914_v11, 0.0 }
 0xa48   :  { %916 = vadd.xlane.f32.xlu1 %v915_v12  ;;  %v1142_v12 = vrot.slane %v2287_v32, %v2096_v48 }
 0xacf   :  { %v913_v16 = vpop.xlane.xlu0 %912 }
 0xad0   :  { %v918_v17 = vmul.f32 0.05, %v913_v16 }
 0xad1   :  { %v917_v18 = vpop.xlane.xlu1 %916 }
 0xad2   :  { %v920_v19 = vmul.f32 %v918_v17, %v918_v17  ;;  %v919_v20 = vmul.f32 0.05, %v917_v18  ;;  %v923_v24 = vsub.f32 %v910_v4, %v918_v17 }
 0xad4   :  { %v921_v21 = vsub.f32 %v919_v20, %v920_v19  ;;  %v1697_v20 = vld [vmem:[%s2440_s1 + $0x170] sm:$0xf] }
 0xad6   :  { %v922_v8 = vmax.f32 %v921_v21, 0.0  ;;  %v1696_v21 = vld [vmem:[%s2440_s1 + $0x168] sm:$0xff] }
 0xad8   :  { %v924_v22 = vadd.f32 1e-05, %v922_v8  ;;  %v1695_v8 = vld [vmem:[%s2440_s1 + $0x160] sm:$0xff] }
 0xada   :  { %1965 = vrsqrt.f32 %v924_v22 }
 0xae7   :  { %v1966_v26 = vpop.eup %1965 }
 0xae8   :  { %v926_v27 = vmul.f32 %v1966_v26, %v923_v24 }
 0xaea   :  { %v931_v6 = vmul.f32 %v930_v25, %v926_v27 }
 0xaec   :  { %v936_v29 = vadd.f32 %v935_v28, %v931_v6 }
 0xaee   :  { %1889 = vmatmul.mubr.msk.f32.vlgmr.msra.gmra.mxu1 %vm34_vm2, %v936_v29 }
 0xaef   :  { %1910 = vmatprep.mubr.msk.f32.mxu1 %vm1976_vm1, %v1975_v0  ;;  %1901 = vmatpush3.msra.mxu1 %v1688_v44 }
 0xaf0   :  { %1902 = vmatprep.subr.mxu1 %v1975_v0 }
 0xaf1   :  { %1903 = vmatpush3.msra.mxu1 %v1687_v45 }
 0xaf2   :  { %1904 = vmatprep.subr.mxu1 %v1975_v0 }
 0xaf3   :  { %1905 = vmatpush3.msra.mxu1 %v1686_v62 }
 0xaf4   :  { %1906 = vmatprep.subr.mxu1 %v1975_v0 }
 0xaf5   :  { %1907 = vmatpush3.msra.mxu1 %v1685_v63 }
 0xaf6   :  { %1908 = vmatprep.subr.mxu1 %v1975_v0 }
 0xaf7   :  { %1909 = vmatpush3.msra.mxu1 %v1684_v1 }
 0xaf8   :  { %1922 = vmatprep.subr.mxu1 %v1975_v0 }
 0xbae   :  { %v1027_v34 = vpop.f32.mrf.mxu1 }
 0xbaf   :  { %v1028_v35 = vadd.f32 %v1027_v34, %v954_v33  ;;  %v1236_v34 = vrot.slane %v2287_v32, %v2116_v5 }
 0xbb0   :  { %v1890_v36 = vpop.f32.mrf.mxu1 }
 0xbb1   :  { %v1031_v37 = vadd.f32 %v1028_v35, %v936_v29 }
 0xbb3   :  { %v1032_v23 = vsel %vm34_vm2, %v1031_v37, 0.0  ;;  %v1035_v38 = vmul.f32 %v1031_v37, %v1031_v37 }
 0xbb4   :  { %1033 = vadd.xlane.f32.xlu0 %v1032_v23 }
 0xbb5   :  { %v1036_v39 = vsel %vm34_vm2, %v1035_v38, 0.0 }
 0xbb6   :  { %1037 = vadd.xlane.f32.xlu1 %v1036_v39  ;;  %v2365_v39 = vld [vmem:[%s2442_s2 + $0x20] sm:$0xff] }
 0xbb7   :  { %v1260_v40 = vrot.slane %v2365_v39, %v2030_v7  ;;  %v1698_v7 = vld [vmem:[%s2440_s1 + $0x178] sm:$0xff]  ;;  %v1357_v62 = vrot.slane %v2365_v39, %v2063_v30 }
 0xbb8   :  { %v1702_v30 = vld [vmem:[%s2440_s1 + $0x198] sm:$0xff] }
 0xc3d   :  { %v1034_v46 = vpop.xlane.xlu0 %1033 }
 0xc3e   :  { %v1039_v47 = vmul.f32 0.05, %v1034_v46 }
 0xc3f   :  { %v1038_v49 = vpop.xlane.xlu1 %1037 }
 0xc40   :  { %v1041_v50 = vmul.f32 %v1039_v47, %v1039_v47  ;;  %v1040_v51 = vmul.f32 0.05, %v1038_v49  ;;  %v1044_v55 = vsub.f32 %v1031_v37, %v1039_v47  ;;  %v1241_v37 = vrot.slane %v2287_v32, %v2119_v9  ;;  %v1700_v49 = vld [vmem:[%s2440_s1 + $0x188] sm:$0xf] }
 0xc42   :  { %v1042_v52 = vsub.f32 %v1040_v51, %v1041_v50  ;;  %v1699_v50 = vld [vmem:[%s2440_s1 + $0x180] sm:$0xff]  ;;  %v1705_v51 = vld [vmem:[%s2440_s1 + $0x1b0] sm:$0xff] }
 0xc44   :  { %v1043_v53 = vmax.f32 %v1042_v52, 0.0  ;;  %v1704_v52 = vld [vmem:[%s2440_s1 + $0x1a8] sm:$0xff] }
 0xc46   :  { %v1045_v54 = vadd.f32 1e-05, %v1043_v53 }
 0xc48   :  { %1967 = vrsqrt.f32 %v1045_v54 }
 0xc55   :  { %v1968_v57 = vpop.eup %1967 }
 0xc56   :  { %v1047_v58 = vmul.f32 %v1968_v57, %v1044_v55 }
 0xc58   :  { %v1052_v60 = vmul.f32 %v1051_v56, %v1047_v58 }
 0xc5a   :  { %v1057_v61 = vadd.f32 %v1056_v59, %v1052_v60 }
 0xc5c   :  { %1898 = vmatmul.mubr.msk.f32.vlgmr.msra.gmra.mxu0 %vm34_vm2, %v1057_v61 }
 0xc5d   :  { %1919 = vmatprep.mubr.msk.f32.mxu0 %vm1976_vm1, %v1975_v0  ;;  %1914 = vmatpush3.msk.msra.mxu0 %vm38_vm0, %v1697_v20 }
 0xc5e   :  { %1915 = vmatprep.subr.mxu0 %v1975_v0 }
 0xc5f   :  { %1916 = vmatpush3.msra.mxu0 %v1696_v21 }
 0xc60   :  { %1917 = vmatprep.subr.mxu0 %v1975_v0 }
 0xc61   :  { %1918 = vmatpush3.msra.mxu0 %v1695_v8 }
 0xc62   :  { %1931 = vmatprep.subr.mxu0 %v1975_v0 }
 0xd1c   :  { %v1134_v3 = vpop.f32.mrf.mxu0 }
 0xd1d   :  { %v1135_v4 = vadd.f32 %v1134_v3, %v1061_v2  ;;  %v1362_v2 = vrot.slane %v2365_v39, %v2066_v31  ;;  %v1701_v31 = vld [vmem:[%s2440_s1 + $0x190] sm:$0xff] }
 0xd1e   :  { %v1899_v10 = vpop.f32.mrf.mxu0 }
 0xd1f   :  { %v1138_v11 = vmax.f32 %v1135_v4, 0.0  ;;  %v1703_v10 = vld [vmem:[%s2440_s1 + $0x1a0] sm:$0xff] }
 0xd21   :  { %1911 = vmatmul.mubr.msk.f32.vlgmr.msra.gmra.mxu1 %vm224_vm3, %v1138_v11  ;;  %v1367_v11 = vrot.slane %v2365_v39, %v2088_v42  ;;  %v1551_v42 = vld [vmem:[%s2443_s3 + $0x10] sm:$0xf] }
 0xd22   :  { %1928 = vmatprep.mubr.msk.f32.mxu1 %vm1976_vm1, %v1975_v0  ;;  %1923 = vmatpush3.msk.msra.mxu1 %vm38_vm0, %v1700_v49 }
 0xd23   :  { %1924 = vmatprep.subr.mxu1 %v1975_v0 }
 0xd24   :  { %1925 = vmatpush3.msra.mxu1 %v1699_v50 }
 0xd25   :  { %1926 = vmatprep.subr.mxu1 %v1975_v0 }
 0xd26   :  { %1927 = vmatpush3.msra.mxu1 %v1698_v7 }
 0xd27   :  { %1944 = vmatprep.subr.mxu1 %v1975_v0 }
 0xde1   :  { %v1212_v13 = vpop.f32.mrf.mxu1 }
 0xde2   :  { %v1213_v14 = vadd.f32 %v1212_v13, %v1142_v12 }
 0xde3   :  { %v1912_v15 = vpop.f32.mrf.mxu1 }
 0xde4   :  { %v1216_v16 = vadd.f32 %v1213_v14, %v1057_v61 }
 0xde6   :  { %v1217_v17 = vsel %vm34_vm2, %v1216_v16, 0.0  ;;  %v1220_v18 = vmul.f32 %v1216_v16, %v1216_v16 }
 0xde7   :  { %1218 = vadd.xlane.f32.xlu0 %v1217_v17 }
 0xde8   :  { %v1221_v19 = vsel %vm34_vm2, %v1220_v18, 0.0 }
 0xde9   :  { %1222 = vadd.xlane.f32.xlu1 %v1221_v19 }
 0xe70   :  { %v1219_v22 = vpop.xlane.xlu0 %1218 }
 0xe71   :  { %v1224_v24 = vmul.f32 0.05, %v1219_v22 }
 0xe72   :  { %v1223_v25 = vpop.xlane.xlu1 %1222 }
 0xe73   :  { %v1226_v26 = vmul.f32 %v1224_v24, %v1224_v24  ;;  %v1225_v27 = vmul.f32 0.05, %v1223_v25  ;;  %v1229_v33 = vsub.f32 %v1216_v16, %v1224_v24  ;;  %v1448_v16 = vrot.slane %v2365_v39, %v2096_v48  ;;  %v1550_v24 = vld [vmem:[%s2443_s3 + $0x8] sm:$0xff]  ;;  %v1549_v48 = vld [vmem:[%s2443_s3] sm:$0xff] }
 0xe75   :  { %v1227_v28 = vsub.f32 %v1225_v27, %v1226_v26 }
 0xe77   :  { %v1228_v6 = vmax.f32 %v1227_v28, 0.0 }
 0xe79   :  { %v1230_v29 = vadd.f32 1e-05, %v1228_v6 }
 0xe7b   :  { %1969 = vrsqrt.f32 %v1230_v29 }
 0xe88   :  { %v1970_v35 = vpop.eup %1969 }
 0xe89   :  { %v1232_v36 = vmul.f32 %v1970_v35, %v1229_v33 }
 0xe8b   :  { %v1237_v23 = vmul.f32 %v1236_v34, %v1232_v36  ;;  %v1542_v36 = vrot.slane %v2365_v39, %v2116_v5 }
 0xe8d   :  { %v1242_v38 = vadd.f32 %v1241_v37, %v1237_v23 }
 0xe8f   :  { %1920 = vmatmul.mubr.msk.f32.vlgmr.msra.gmra.mxu0 %vm34_vm2, %v1242_v38 }
 0xe90   :  { %1941 = vmatprep.mubr.msk.f32.mxu0 %vm1976_vm1, %v1975_v0  ;;  %1932 = vmatpush3.msra.mxu0 %v1705_v51 }
 0xe91   :  { %1933 = vmatprep.subr.mxu0 %v1975_v0 }
 0xe92   :  { %1934 = vmatpush3.msra.mxu0 %v1704_v52 }
 0xe93   :  { %1935 = vmatprep.subr.mxu0 %v1975_v0 }
 0xe94   :  { %1936 = vmatpush3.msra.mxu0 %v1703_v10 }
 0xe95   :  { %1937 = vmatprep.subr.mxu0 %v1975_v0 }
 0xe96   :  { %1938 = vmatpush3.msra.mxu0 %v1702_v30 }
 0xe97   :  { %1939 = vmatprep.subr.mxu0 %v1975_v0 }
 0xe98   :  { %1940 = vmatpush3.msra.mxu0 %v1701_v31 }
 0xf4f   :  { %v1333_v41 = vpop.f32.mrf.mxu0 }
 0xf50   :  { %v1334_v43 = vadd.f32 %v1333_v41, %v1260_v40  ;;  %v1712_v41 = vld [vmem:[%s2443_s3 + $0x14] ss:$0 sm:$0xff] }
 0xf51   :  { %v1921_v44 = vpop.f32.mrf.mxu0 }
 0xf52   :  { %v1337_v45 = vadd.f32 %v1334_v43, %v1242_v38  ;;  %v1547_v38 = vrot.slane %v2365_v39, %v2119_v9 }
 0xf54   :  { %v1338_v32 = vsel %vm34_vm2, %v1337_v45, 0.0  ;;  %v1341_v46 = vmul.f32 %v1337_v45, %v1337_v45 }
 0xf55   :  { %1339 = vadd.xlane.f32.xlu0 %v1338_v32 }
 0xf56   :  { %v1342_v47 = vsel %vm34_vm2, %v1341_v46, 0.0 }
 0xf57   :  { %1343 = vadd.xlane.f32.xlu1 %v1342_v47 }
 0xfde   :  { %v1340_v53 = vpop.xlane.xlu0 %1339 }
 0xfdf   :  { %v1345_v54 = vmul.f32 0.05, %v1340_v53 }
 0xfe0   :  { %v1344_v55 = vpop.xlane.xlu1 %1343 }
 0xfe1   :  { %v1347_v56 = vmul.f32 %v1345_v54, %v1345_v54  ;;  %v1346_v57 = vmul.f32 0.05, %v1344_v55  ;;  %v1350_v61 = vsub.f32 %v1337_v45, %v1345_v54 }
 0xfe3   :  { %v1348_v58 = vsub.f32 %v1346_v57, %v1347_v56 }
 0xfe5   :  { %v1349_v59 = vmax.f32 %v1348_v58, 0.0 }
 0xfe7   :  { %v1351_v60 = vadd.f32 1e-05, %v1349_v59 }
 0xfe9   :  { %1971 = vrsqrt.f32 %v1351_v60 }
 0xff6   :  { %v1972_v63 = vpop.eup %1971 }
 0xff7   :  { %v1353_v1 = vmul.f32 %v1972_v63, %v1350_v61 }
 0xff9   :  { %v1358_v3 = vmul.f32 %v1357_v62, %v1353_v1 }
 0xffb   :  { %v1363_v4 = vadd.f32 %v1362_v2, %v1358_v3 }
 0xffd   :  { %1929 = vmatmul.mubr.msk.f32.vlgmr.msra.gmra.mxu1 %vm34_vm2, %v1363_v4 }
 0xffe   :  { %1950 = vmatprep.mubr.msk.f32.mxu1 %vm1976_vm1, %v1975_v0  ;;  %1945 = vmatpush3.msk.msra.mxu1 %vm38_vm0, %v1551_v42 }
 0xfff   :  { %1946 = vmatprep.subr.mxu1 %v1975_v0 }
0x1000   :  { %1947 = vmatpush3.msra.mxu1 %v1550_v24 }
0x1001   :  { %1948 = vmatprep.subr.mxu1 %v1975_v0 }
0x1002   :  { %1949 = vmatpush3.msra.mxu1 %v1549_v48 }
0x10bd   :  { %v1440_v12 = vpop.f32.mrf.mxu1 }
0x10be   :  { %v1441_v13 = vadd.f32 %v1440_v12, %v1367_v11 }
0x10bf   :  { %v1930_v14 = vpop.f32.mrf.mxu1 }
0x10c0   :  { %v1444_v15 = vmax.f32 %v1441_v13, 0.0 }
0x10c2   :  { %1942 = vmatmul.mubr.msk.f32.vlgmr.msra.gmra.mxu0 %vm224_vm3, %v1444_v15 }
0x1182   :  { %v1518_v17 = vpop.f32.mrf.mxu0 }
0x1183   :  { %v1519_v18 = vadd.f32 %v1518_v17, %v1448_v16 }
0x1184   :  { %v1943_v19 = vpop.f32.mrf.mxu0 }
0x1185   :  { %v1522_v20 = vadd.f32 %v1519_v18, %v1363_v4 }
0x1187   :  { %v1523_v21 = vsel %vm34_vm2, %v1522_v20, 0.0  ;;  %v1526_v8 = vmul.f32 %v1522_v20, %v1522_v20 }
0x1188   :  { %1524 = vadd.xlane.f32.xlu0 %v1523_v21 }
0x1189   :  { %v1527_v22 = vsel %vm34_vm2, %v1526_v8, 0.0 }
0x118a   :  { %1528 = vadd.xlane.f32.xlu1 %v1527_v22 }
0x1211   :  { %v1525_v25 = vpop.xlane.xlu0 %1524 }
0x1212   :  { %v1530_v26 = vmul.f32 0.05, %v1525_v25 }
0x1213   :  { %v1529_v27 = vpop.xlane.xlu1 %1528 }
0x1214   :  { %v1532_v28 = vmul.f32 %v1530_v26, %v1530_v26  ;;  %v1531_v6 = vmul.f32 0.05, %v1529_v27  ;;  %v1535_v35 = vsub.f32 %v1522_v20, %v1530_v26 }
0x1216   :  { %v1533_v29 = vsub.f32 %v1531_v6, %v1532_v28 }
0x1218   :  { %v1534_v33 = vmax.f32 %v1533_v29, 0.0 }
0x121a   :  { %v1536_v34 = vadd.f32 1e-05, %v1534_v33 }
0x121c   :  { %1973 = vrsqrt.f32 %v1536_v34 }
0x1229   :  { %v1974_v37 = vpop.eup %1973 }
0x122a   :  { %v1538_v23 = vmul.f32 %v1974_v37, %v1535_v35 }
0x122c   :  { %v1543_v0 = vmul.f32 %v1542_v36, %v1538_v23 }
0x122e   :  { %v1548_v40 = vadd.f32 %v1547_v38, %v1543_v0 }
0x1230   :  { %1951 = vmatmul.mubr.msk.f32.vlgmr.msra.gmra.mxu1 %vm34_vm2, %v1548_v40 }
0x12f0   :  { %v1629_v43 = vpop.f32.mrf.mxu1 }
0x12f1   :  { %v1630_v44 = vadd.f32 %v1712_v41, %v1629_v43 }
0x12f2   :  { %v1952_v45 = vpop.f32.mrf.mxu1 }
0x12f3   :  { %1634 = vst.msk [vmem:[%s2444_s4] sm:$0xff] %vm1633_vm4, %v1630_v44 }

</bundles_post_ra>
